<compile_context>
chip_gen: v6e
topology: v6e:2x2x1
jax: 0.10.0
libtpu: 0.0.40
codegen_flags: <defaults>
</compile_context>

<pallas_src>
import jax
import jax.numpy as jnp
from jax.experimental import pallas as pl
from jax.experimental.pallas import tpu as pltpu

CHANNELS = 1
CLASSES = 10
# DATA_MEAN / DATA_STD are not given in the snippet; use standard MNIST constants.
DATA_MEAN = 0.1307
DATA_STD = 0.3081
DATA_SUBZERO = (0.0 - DATA_MEAN) / DATA_STD

_VMEM_LIMIT = 32 * 1024 * 1024  # safe on v5e/v6e (128 MiB) and v7x (64 MiB)


def _round_up(x, m):
    return (x + m - 1) // m * m


# ---------------------------- Pallas kernels ----------------------------

def _conv_pool_kernel(p_ref, w_ref, b_ref, o_ref):
    """Fused conv + bias + ReLU + 2x2 max-pool for one M-tile.

    p_ref: (4, K, TM) pool-tap-major im2col patches (M on lanes)
    w_ref: (Cout, K)   b_ref: (Cout, 1)   o_ref: (Cout, TM)
    """
    w = w_ref[...]
    y = jnp.dot(w, p_ref[0], preferred_element_type=jnp.float32)
    for t in range(1, 4):  # max over the 4 pool taps (ReLU/bias commute with max)
        y = jnp.maximum(y, jnp.dot(w, p_ref[t], preferred_element_type=jnp.float32))
    o_ref[...] = jnp.maximum(y + b_ref[...], 0.0)


def _conv4_linear_kernel(x_ref, w4_ref, b4_ref, wl_ref, bl_ref, o_ref):
    """Fused conv4 (== FC 512->64) + ReLU + Linear(64->10); (B,64) stays in VMEM/vregs.

    x_ref: (TB, 512)  w4_ref: (512, 64)  b4_ref: (1, 64)  wl_ref: (64, 10)
    bl_ref: (1, 10)   o_ref: (TB, 10)
    """
    h = jnp.dot(x_ref[...], w4_ref[...], preferred_element_type=jnp.float32)
    h = jnp.maximum(h + b4_ref[...], 0.0)
    o_ref[...] = jnp.dot(h, wl_ref[...], preferred_element_type=jnp.float32) + bl_ref[...]


# ---------------------------- Pallas wrappers ----------------------------

def _pallas_conv_relu_pool(patches, w2d, b, tile_m=512):
    """patches: (4, K, M) f32, w2d: (Cout, K), b: (Cout,). Returns pooled (Cout, M)."""
    _, K, M = patches.shape
    Cout = w2d.shape[0]
    tm = min(tile_m, _round_up(M, 128))          # lane-dim tile: multiple of 128
    m_pad = _round_up(M, tm)
    if m_pad != M:
        patches = jnp.pad(patches, ((0, 0), (0, 0), (0, m_pad - M)))
    out = pl.pallas_call(
        _conv_pool_kernel,
        out_shape=jax.ShapeDtypeStruct((Cout, m_pad), jnp.float32),
        grid=(m_pad // tm,),
        in_specs=[
            pl.BlockSpec((4, K, tm), lambda i: (0, 0, i)),
            pl.BlockSpec((Cout, K), lambda i: (0, 0)),
            pl.BlockSpec((Cout, 1), lambda i: (0, 0)),
        ],
        out_specs=pl.BlockSpec((Cout, tm), lambda i: (0, i)),
        compiler_params=pltpu.CompilerParams(
            dimension_semantics=("parallel",),
            vmem_limit_bytes=_VMEM_LIMIT),
    )(patches.astype(jnp.float32), w2d.astype(jnp.float32),
      b.reshape(Cout, 1).astype(jnp.float32))
    return out[:, :M]


def _pallas_conv4_linear(x4, w4, b4, wl, bl, tile_b=256):
    """x4: (B, 512). Fused conv4+ReLU+Linear -> (B, 10)."""
    B, K = x4.shape
    Cmid = w4.shape[1]
    tb = B
    if B % 8 == 0:                                # sublane-dim tile: multiple of 8
        tb = min(tile_b, B)
        while B % tb:
            tb -= 8
    return pl.pallas_call(
        _conv4_linear_kernel,
        out_shape=jax.ShapeDtypeStruct((B, CLASSES), jnp.float32),
        grid=(B // tb,),
        in_specs=[
            pl.BlockSpec((tb, K), lambda i: (i, 0)),
            pl.BlockSpec((K, Cmid), lambda i: (0, 0)),
            pl.BlockSpec((1, Cmid), lambda i: (0, 0)),
            pl.BlockSpec((Cmid, CLASSES), lambda i: (0, 0)),
            pl.BlockSpec((1, CLASSES), lambda i: (0, 0)),
        ],
        out_specs=pl.BlockSpec((tb, CLASSES), lambda i: (i, 0)),
        compiler_params=pltpu.CompilerParams(
            dimension_semantics=("parallel",),
            vmem_limit_bytes=_VMEM_LIMIT),
    )(x4.astype(jnp.float32), w4.astype(jnp.float32),
      b4.reshape(1, Cmid).astype(jnp.float32), wl.astype(jnp.float32),
      bl.reshape(1, CLASSES).astype(jnp.float32))


# ---------------------------- glue: pool-tap-major im2col (XLA) ----------------------------

def _pooled_patches(act, kh, kw, pad, pad_value):
    """Build pool-tap-major transposed im2col patches for a conv followed by MaxPool2d(2).

    act: (Cin, B, H, W) channel-major activation.
    Returns (4, kh*kw*Cin, B*po*po): column m = (b, io, jo) row-major, rows ordered
    (di, dj, ci), leading axis = the 4 pool taps (ti, tj).  For the odd-sized stage
    (conv3) the module zero-pads right/bottom before pooling; since every ReLU output
    is >= 0, clamping the tap index to the last real conv row/column is equivalent.
    """
    Cin, B, H, W = act.shape
    a = jnp.pad(act, ((0, 0), (0, 0), (pad, pad), (pad, pad)),
                constant_values=pad_value)
    ho = H + 2 * pad - kh + 1          # conv output size
    po = (ho + 1) // 2                 # pool output size
    base = jnp.arange(po)
    taps = []
    for ti in range(2):
        for tj in range(2):
            ih = jnp.clip(2 * base + ti, 0, ho - 1)
            iw = jnp.clip(2 * base + tj, 0, ho - 1)
            rows = []
            for di in range(kh):
                for dj in range(kw):
                    g = a[:, :, ih + di, :][:, :, :, iw + dj]      # (Cin, B, po, po)
                    rows.append(g.reshape(Cin, B * po * po))
            taps.append(jnp.concatenate(rows, axis=0))             # (kh*kw*Cin, M)
    return jnp.stack(taps, axis=0)                                 # (4, K, M)


# ---------------------------- model ----------------------------

def init_params(key, ch=(8, 16, 32, 64)):
    keys = jax.random.split(key, 10)

    def conv_w(k, cout, cin, kh, kw):
        fan_in = cin * kh * kw
        return jax.random.normal(k, (cout, cin, kh, kw), jnp.float32) / jnp.sqrt(fan_in)

    return {
        "w1": conv_w(keys[0], ch[0], CHANNELS, 3, 3),
        "b1": 0.01 * jax.random.normal(keys[1], (ch[0],), jnp.float32),
        "w2": conv_w(keys[2], ch[1], ch[0], 3, 3),
        "b2": 0.01 * jax.random.normal(keys[3], (ch[1],), jnp.float32),
        "w3": conv_w(keys[4], ch[2], ch[1], 3, 3),
        "b3": 0.01 * jax.random.normal(keys[5], (ch[2],), jnp.float32),
        "w4": conv_w(keys[6], ch[3], ch[2], 4, 4),
        "b4": 0.01 * jax.random.normal(keys[7], (ch[3],), jnp.float32),
        # Linear(64, 10): stored as (in, out) so forward is x @ wl + bl
        "wl": jax.random.normal(keys[8], (ch[3], CLASSES), jnp.float32) / jnp.sqrt(ch[3]),
        "bl": 0.01 * jax.random.normal(keys[9], (CLASSES,), jnp.float32),
    }


def conv5_forward(x_nchw, p, use_pallas=True):
    """Replica of Conv5Model.forward; expects NCHW (B, 1, 28, 28)."""
    if not use_pallas:
        return _conv5_reference(x_nchw, p)

    B = x_nchw.shape[0]

    def w_conv(w_oihw):   # (Cout, Cin, KH, KW) -> (Cout, KH*KW*Cin) in (di, dj, ci) order
        cout = w_oihw.shape[0]
        return jnp.transpose(w_oihw, (0, 2, 3, 1)).reshape(cout, -1)

    act = jnp.transpose(x_nchw.astype(jnp.float32), (1, 0, 2, 3))      # (1, B, 28, 28)

    # stage 1: ConstantPad2d(1, DATA_SUBZERO) -> conv1(3x3) -> ReLU -> MaxPool2d(2)
    p1 = _pooled_patches(act, 3, 3, 1, DATA_SUBZERO)                   # (4, 9, B*196)
    act = _pallas_conv_relu_pool(p1, w_conv(p["w1"]), p["b1"])         # (8, B*196)
    act = act.reshape(8, B, 14, 14)

    # stage 2: conv2(3x3, pad=1) -> ReLU -> MaxPool2d(2)
    p2 = _pooled_patches(act, 3, 3, 1, 0.0)                            # (4, 72, B*49)
    act = _pallas_conv_relu_pool(p2, w_conv(p["w2"]), p["b2"])         # (16, B*49)
    act = act.reshape(16, B, 7, 7)

    # stage 3: conv3(3x3, pad=1) -> ReLU -> ConstantPad2d((0,1,0,1), 0) -> MaxPool2d(2)
    p3 = _pooled_patches(act, 3, 3, 1, 0.0)                            # (4, 144, B*16)
    act = _pallas_conv_relu_pool(p3, w_conv(p["w3"]), p["b3"])         # (32, B*16)

    # stage 4: conv4(4x4 on 4x4) == FC(512->64) -> ReLU -> Linear(64->10), fused
    x4 = jnp.transpose(act.reshape(32, B, 4, 4), (1, 2, 3, 0)).reshape(B, 512)
    w4 = jnp.transpose(p["w4"], (2, 3, 1, 0)).reshape(512, 64)
    return _pallas_conv4_linear(x4, w4, p["b4"], p["wl"], p["bl"])


# ---------------------------- pure-JAX reference ----------------------------

def _conv5_reference(x_nchw, p):
    x = jnp.transpose(x_nchw.astype(jnp.float32), (0, 2, 3, 1))        # NHWC

    def conv_relu(x, w_oihw, b, pad, pad_value=0.0):
        cout, cin, kh, kw = w_oihw.shape
        if pad:
            x = jnp.pad(x, ((0, 0), (pad, pad), (pad, pad), (0, 0)),
                        constant_values=pad_value)
        bsz, hp, wp, _ = x.shape
        ho, wo = hp - kh + 1, wp - kw + 1
        cols = [x[:, i:i + ho, j:j + wo, :] for i in range(kh) for j in range(kw)]
        patches = jnp.concatenate(cols, axis=-1).reshape(bsz * ho * wo, kh * kw * cin)
        w2 = jnp.transpose(w_oihw, (2, 3, 1, 0)).reshape(kh * kw * cin, cout)
        y = jnp.dot(patches, w2, precision=jax.lax.Precision.HIGHEST) + b[None, :]
        return jnp.maximum(y, 0.0).reshape(bsz, ho, wo, cout)

    def pool(x):
        bsz, h, w, c = x.shape
        return jnp.max(x.reshape(bsz, h // 2, 2, w // 2, 2, c), axis=(2, 4))

    x = conv_relu(x, p["w1"], p["b1"], 1, DATA_SUBZERO)                # (B,28,28,8)
    x = pool(x)                                                        # (B,14,14,8)
    x = conv_relu(x, p["w2"], p["b2"], 1)                              # (B,14,14,16)
    x = pool(x)                                                        # (B,7,7,16)
    x = conv_relu(x, p["w3"], p["b3"], 1)                              # (B,7,7,32)
    x = jnp.pad(x, ((0, 0), (0, 1), (0, 1), (0, 0)))                   # (B,8,8,32)
    x = pool(x)                                                        # (B,4,4,32)
    x = conv_relu(x, p["w4"], p["b4"], 0)                              # (B,1,1,64)
    x = x.reshape(x.shape[0], -1)
    return jnp.dot(x, p["wl"], precision=jax.lax.Precision.HIGHEST) + p["bl"][None, :]


if __name__ == "__main__":
    key = jax.random.PRNGKey(0)
    pkey, xkey = jax.random.split(key)
    params = init_params(pkey)
    B = 16  # small, but enough to exercise the tiled 'parallel' grid (7 steps on stage 1)
    x = jax.random.normal(xkey, (B, CHANNELS, 28, 28), jnp.float32)

    fwd = jax.jit(lambda xx, pp: conv5_forward(xx, pp, use_pallas=True))
    logits = jax.block_until_ready(fwd(x, params))

    ref = _conv5_reference(x, params)
    assert logits.shape == (B, CLASSES)
    assert bool(jnp.all(jnp.isfinite(logits)))
    assert bool(jnp.allclose(logits, ref, rtol=2e-2, atol=2e-2))
    print("KERNEL_OK")
</pallas_src>

<mosaic_0001>
module attributes {stable_mosaic.version = 11 : i64} {
  func.func @_conv_pool_kernel(%arg0: i32, %arg1: memref<4x9x512xf32, #tpu.memory_space<vmem>>, %arg2: memref<8x9xf32, #tpu.memory_space<vmem>>, %arg3: memref<8x1xf32, #tpu.memory_space<vmem>>, %arg4: memref<8x512xf32, #tpu.memory_space<vmem>>) attributes {dimension_semantics = [#tpu.dimension_semantics<parallel>], iteration_bounds = array<i64: 7>, scalar_prefetch = 0 : i64, scratch_operands = 0 : i64, tpu.core_type = #tpu.core_type<tc>, window_params = [{transform_indices = @transform_0, window_bounds = array<i64: 4, 9, 512>}, {pipeline_mode = #tpu.pipeline_mode<synchronous>, transform_indices = @transform_1, window_bounds = array<i64: 8, 9>}, {pipeline_mode = #tpu.pipeline_mode<synchronous>, transform_indices = @transform_2, window_bounds = array<i64: 8, 1>}, {transform_indices = @transform_3, window_bounds = array<i64: 8, 512>}]} {
    %c0 = arith.constant 0 : index
    %c0_0 = arith.constant 0 : index
    %0 = vector.load %arg2[%c0, %c0_0] : memref<8x9xf32, #tpu.memory_space<vmem>>, vector<8x9xf32>
    %c0_1 = arith.constant 0 : index
    %c0_2 = arith.constant 0 : index
    %c0_3 = arith.constant 0 : index
    %1 = vector.load %arg1[%c0_1, %c0_2, %c0_3] : memref<4x9x512xf32, #tpu.memory_space<vmem>>, vector<1x9x512xf32>
    %2 = vector.shape_cast %1 : vector<1x9x512xf32> to vector<9x512xf32>
    %cst = arith.constant dense<0.000000e+00> : vector<8x512xf32>
    %3 = tpu.matmul %0, %2, %cst {dimension_numbers = #tpu.dot_dimension_numbers<[1], [0], [0], [1], [0, 0, 1, 1], [], []>} : vector<8x9xf32>, vector<9x512xf32>, vector<8x512xf32> -> vector<8x512xf32>
    %c1 = arith.constant 1 : index
    %c0_4 = arith.constant 0 : index
    %c0_5 = arith.constant 0 : index
    %4 = vector.load %arg1[%c1, %c0_4, %c0_5] : memref<4x9x512xf32, #tpu.memory_space<vmem>>, vector<1x9x512xf32>
    %5 = vector.shape_cast %4 : vector<1x9x512xf32> to vector<9x512xf32>
    %cst_6 = arith.constant dense<0.000000e+00> : vector<8x512xf32>
    %6 = tpu.matmul %0, %5, %cst_6 {dimension_numbers = #tpu.dot_dimension_numbers<[1], [0], [0], [1], [0, 0, 1, 1], [], []>} : vector<8x9xf32>, vector<9x512xf32>, vector<8x512xf32> -> vector<8x512xf32>
    %7 = arith.maximumf %3, %6 : vector<8x512xf32>
    %c2 = arith.constant 2 : index
    %c0_7 = arith.constant 0 : index
    %c0_8 = arith.constant 0 : index
    %8 = vector.load %arg1[%c2, %c0_7, %c0_8] : memref<4x9x512xf32, #tpu.memory_space<vmem>>, vector<1x9x512xf32>
    %9 = vector.shape_cast %8 : vector<1x9x512xf32> to vector<9x512xf32>
    %cst_9 = arith.constant dense<0.000000e+00> : vector<8x512xf32>
    %10 = tpu.matmul %0, %9, %cst_9 {dimension_numbers = #tpu.dot_dimension_numbers<[1], [0], [0], [1], [0, 0, 1, 1], [], []>} : vector<8x9xf32>, vector<9x512xf32>, vector<8x512xf32> -> vector<8x512xf32>
    %11 = arith.maximumf %7, %10 : vector<8x512xf32>
    %c3 = arith.constant 3 : index
    %c0_10 = arith.constant 0 : index
    %c0_11 = arith.constant 0 : index
    %12 = vector.load %arg1[%c3, %c0_10, %c0_11] : memref<4x9x512xf32, #tpu.memory_space<vmem>>, vector<1x9x512xf32>
    %13 = vector.shape_cast %12 : vector<1x9x512xf32> to vector<9x512xf32>
    %cst_12 = arith.constant dense<0.000000e+00> : vector<8x512xf32>
    %14 = tpu.matmul %0, %13, %cst_12 {dimension_numbers = #tpu.dot_dimension_numbers<[1], [0], [0], [1], [0, 0, 1, 1], [], []>} : vector<8x9xf32>, vector<9x512xf32>, vector<8x512xf32> -> vector<8x512xf32>
    %15 = arith.maximumf %11, %14 : vector<8x512xf32>
    %c0_13 = arith.constant 0 : index
    %c0_14 = arith.constant 0 : index
    %16 = vector.load %arg3[%c0_13, %c0_14] : memref<8x1xf32, #tpu.memory_space<vmem>>, vector<8x1xf32>
    %17 = vector.broadcast %16 : vector<8x1xf32> to vector<8x512xf32>
    %18 = arith.addf %15, %17 : vector<8x512xf32>
    %cst_15 = arith.constant 0.000000e+00 : f32
    %19 = vector.broadcast %cst_15 : f32 to vector<8x512xf32>
    %20 = arith.maximumf %18, %19 : vector<8x512xf32>
    %c0_16 = arith.constant 0 : index
    %c0_17 = arith.constant 0 : index
    %21 = vector.load %arg4[%c0_16, %c0_17] : memref<8x512xf32, #tpu.memory_space<vmem>>, vector<8x512xf32>
    tpu.vector_store %arg4[%c0_16, %c0_17], %20 {strides = array<i32>} : memref<8x512xf32, #tpu.memory_space<vmem>>, vector<8x512xf32>,
    return
  }
  func.func @transform_0(%arg0: i32) -> (i32, i32, i32) {
    %c0_i32 = arith.constant 0 : i32
    %c0_i32_0 = arith.constant 0 : i32
    %c0_i32_1 = arith.constant 0 : i32
    return %c0_i32, %c0_i32_0, %arg0 : i32, i32, i32
  }
  func.func @transform_1(%arg0: i32) -> (i32, i32) {
    %c0_i32 = arith.constant 0 : i32
    %c0_i32_0 = arith.constant 0 : i32
    %c0_i32_1 = arith.constant 0 : i32
    return %c0_i32, %c0_i32_0 : i32, i32
  }
  func.func @transform_2(%arg0: i32) -> (i32, i32) {
    %c0_i32 = arith.constant 0 : i32
    %c0_i32_0 = arith.constant 0 : i32
    %c0_i32_1 = arith.constant 0 : i32
    return %c0_i32, %c0_i32_0 : i32, i32
  }
  func.func @transform_3(%arg0: i32) -> (i32, i32) {
    %c0_i32 = arith.constant 0 : i32
    %c0_i32_0 = arith.constant 0 : i32
    return %c0_i32, %arg0 : i32, i32
  }
}

module attributes {stable_mosaic.version = 11 : i64} {
  func.func @_conv_pool_kernel(%arg0: i32, %arg1: memref<4x72x512xf32, #tpu.memory_space<vmem>>, %arg2: memref<16x72xf32, #tpu.memory_space<vmem>>, %arg3: memref<16x1xf32, #tpu.memory_space<vmem>>, %arg4: memref<16x512xf32, #tpu.memory_space<vmem>>) attributes {dimension_semantics = [#tpu.dimension_semantics<parallel>], iteration_bounds = array<i64: 2>, scalar_prefetch = 0 : i64, scratch_operands = 0 : i64, tpu.core_type = #tpu.core_type<tc>, window_params = [{transform_indices = @transform_0, window_bounds = array<i64: 4, 72, 512>}, {pipeline_mode = #tpu.pipeline_mode<synchronous>, transform_indices = @transform_1, window_bounds = array<i64: 16, 72>}, {pipeline_mode = #tpu.pipeline_mode<synchronous>, transform_indices = @transform_2, window_bounds = array<i64: 16, 1>}, {transform_indices = @transform_3, window_bounds = array<i64: 16, 512>}]} {
    %c0 = arith.constant 0 : index
    %c0_0 = arith.constant 0 : index
    %0 = vector.load %arg2[%c0, %c0_0] : memref<16x72xf32, #tpu.memory_space<vmem>>, vector<16x72xf32>
    %c0_1 = arith.constant 0 : index
    %c0_2 = arith.constant 0 : index
    %c0_3 = arith.constant 0 : index
    %1 = vector.load %arg1[%c0_1, %c0_2, %c0_3] : memref<4x72x512xf32, #tpu.memory_space<vmem>>, vector<1x72x512xf32>
    %2 = vector.shape_cast %1 : vector<1x72x512xf32> to vector<72x512xf32>
    %cst = arith.constant dense<0.000000e+00> : vector<16x512xf32>
    %3 = tpu.matmul %0, %2, %cst {dimension_numbers = #tpu.dot_dimension_numbers<[1], [0], [0], [1], [0, 0, 1, 1], [], []>} : vector<16x72xf32>, vector<72x512xf32>, vector<16x512xf32> -> vector<16x512xf32>
    %c1 = arith.constant 1 : index
    %c0_4 = arith.constant 0 : index
    %c0_5 = arith.constant 0 : index
    %4 = vector.load %arg1[%c1, %c0_4, %c0_5] : memref<4x72x512xf32, #tpu.memory_space<vmem>>, vector<1x72x512xf32>
    %5 = vector.shape_cast %4 : vector<1x72x512xf32> to vector<72x512xf32>
    %cst_6 = arith.constant dense<0.000000e+00> : vector<16x512xf32>
    %6 = tpu.matmul %0, %5, %cst_6 {dimension_numbers = #tpu.dot_dimension_numbers<[1], [0], [0], [1], [0, 0, 1, 1], [], []>} : vector<16x72xf32>, vector<72x512xf32>, vector<16x512xf32> -> vector<16x512xf32>
    %7 = arith.maximumf %3, %6 : vector<16x512xf32>
    %c2 = arith.constant 2 : index
    %c0_7 = arith.constant 0 : index
    %c0_8 = arith.constant 0 : index
    %8 = vector.load %arg1[%c2, %c0_7, %c0_8] : memref<4x72x512xf32, #tpu.memory_space<vmem>>, vector<1x72x512xf32>
    %9 = vector.shape_cast %8 : vector<1x72x512xf32> to vector<72x512xf32>
    %cst_9 = arith.constant dense<0.000000e+00> : vector<16x512xf32>
    %10 = tpu.matmul %0, %9, %cst_9 {dimension_numbers = #tpu.dot_dimension_numbers<[1], [0], [0], [1], [0, 0, 1, 1], [], []>} : vector<16x72xf32>, vector<72x512xf32>, vector<16x512xf32> -> vector<16x512xf32>
    %11 = arith.maximumf %7, %10 : vector<16x512xf32>
    %c3 = arith.constant 3 : index
    %c0_10 = arith.constant 0 : index
    %c0_11 = arith.constant 0 : index
    %12 = vector.load %arg1[%c3, %c0_10, %c0_11] : memref<4x72x512xf32, #tpu.memory_space<vmem>>, vector<1x72x512xf32>
    %13 = vector.shape_cast %12 : vector<1x72x512xf32> to vector<72x512xf32>
    %cst_12 = arith.constant dense<0.000000e+00> : vector<16x512xf32>
    %14 = tpu.matmul %0, %13, %cst_12 {dimension_numbers = #tpu.dot_dimension_numbers<[1], [0], [0], [1], [0, 0, 1, 1], [], []>} : vector<16x72xf32>, vector<72x512xf32>, vector<16x512xf32> -> vector<16x512xf32>
    %15 = arith.maximumf %11, %14 : vector<16x512xf32>
    %c0_13 = arith.constant 0 : index
    %c0_14 = arith.constant 0 : index
    %16 = vector.load %arg3[%c0_13, %c0_14] : memref<16x1xf32, #tpu.memory_space<vmem>>, vector<16x1xf32>
    %17 = vector.broadcast %16 : vector<16x1xf32> to vector<16x512xf32>
    %18 = arith.addf %15, %17 : vector<16x512xf32>
    %cst_15 = arith.constant 0.000000e+00 : f32
    %19 = vector.broadcast %cst_15 : f32 to vector<16x512xf32>
    %20 = arith.maximumf %18, %19 : vector<16x512xf32>
    %c0_16 = arith.constant 0 : index
    %c0_17 = arith.constant 0 : index
    %21 = vector.load %arg4[%c0_16, %c0_17] : memref<16x512xf32, #tpu.memory_space<vmem>>, vector<16x512xf32>
    tpu.vector_store %arg4[%c0_16, %c0_17], %20 {strides = array<i32>} : memref<16x512xf32, #tpu.memory_space<vmem>>, vector<16x512xf32>,
    return
  }
  func.func @transform_0(%arg0: i32) -> (i32, i32, i32) {
    %c0_i32 = arith.constant 0 : i32
    %c0_i32_0 = arith.constant 0 : i32
    %c0_i32_1 = arith.constant 0 : i32
    return %c0_i32, %c0_i32_0, %arg0 : i32, i32, i32
  }
  func.func @transform_1(%arg0: i32) -> (i32, i32) {
    %c0_i32 = arith.constant 0 : i32
    %c0_i32_0 = arith.constant 0 : i32
    %c0_i32_1 = arith.constant 0 : i32
    return %c0_i32, %c0_i32_0 : i32, i32
  }
  func.func @transform_2(%arg0: i32) -> (i32, i32) {
    %c0_i32 = arith.constant 0 : i32
    %c0_i32_0 = arith.constant 0 : i32
    %c0_i32_1 = arith.constant 0 : i32
    return %c0_i32, %c0_i32_0 : i32, i32
  }
  func.func @transform_3(%arg0: i32) -> (i32, i32) {
    %c0_i32 = arith.constant 0 : i32
    %c0_i32_0 = arith.constant 0 : i32
    return %c0_i32, %arg0 : i32, i32
  }
}

module attributes {stable_mosaic.version = 11 : i64} {
  func.func @_conv_pool_kernel(%arg0: i32, %arg1: memref<4x144x256xf32, #tpu.memory_space<vmem>>, %arg2: memref<32x144xf32, #tpu.memory_space<vmem>>, %arg3: memref<32x1xf32, #tpu.memory_space<vmem>>, %arg4: memref<32x256xf32, #tpu.memory_space<vmem>>) attributes {dimension_semantics = [#tpu.dimension_semantics<parallel>], iteration_bounds = array<i64: 1>, scalar_prefetch = 0 : i64, scratch_operands = 0 : i64, tpu.core_type = #tpu.core_type<tc>, window_params = [{transform_indices = @transform_0, window_bounds = array<i64: 4, 144, 256>}, {pipeline_mode = #tpu.pipeline_mode<synchronous>, transform_indices = @transform_1, window_bounds = array<i64: 32, 144>}, {pipeline_mode = #tpu.pipeline_mode<synchronous>, transform_indices = @transform_2, window_bounds = array<i64: 32, 1>}, {transform_indices = @transform_3, window_bounds = array<i64: 32, 256>}]} {
    %c0 = arith.constant 0 : index
    %c0_0 = arith.constant 0 : index
    %0 = vector.load %arg2[%c0, %c0_0] : memref<32x144xf32, #tpu.memory_space<vmem>>, vector<32x144xf32>
    %c0_1 = arith.constant 0 : index
    %c0_2 = arith.constant 0 : index
    %c0_3 = arith.constant 0 : index
    %1 = vector.load %arg1[%c0_1, %c0_2, %c0_3] : memref<4x144x256xf32, #tpu.memory_space<vmem>>, vector<1x144x256xf32>
    %2 = vector.shape_cast %1 : vector<1x144x256xf32> to vector<144x256xf32>
    %cst = arith.constant dense<0.000000e+00> : vector<32x256xf32>
    %3 = tpu.matmul %0, %2, %cst {dimension_numbers = #tpu.dot_dimension_numbers<[1], [0], [0], [1], [0, 0, 1, 1], [], []>} : vector<32x144xf32>, vector<144x256xf32>, vector<32x256xf32> -> vector<32x256xf32>
    %c1 = arith.constant 1 : index
    %c0_4 = arith.constant 0 : index
    %c0_5 = arith.constant 0 : index
    %4 = vector.load %arg1[%c1, %c0_4, %c0_5] : memref<4x144x256xf32, #tpu.memory_space<vmem>>, vector<1x144x256xf32>
    %5 = vector.shape_cast %4 : vector<1x144x256xf32> to vector<144x256xf32>
    %cst_6 = arith.constant dense<0.000000e+00> : vector<32x256xf32>
    %6 = tpu.matmul %0, %5, %cst_6 {dimension_numbers = #tpu.dot_dimension_numbers<[1], [0], [0], [1], [0, 0, 1, 1], [], []>} : vector<32x144xf32>, vector<144x256xf32>, vector<32x256xf32> -> vector<32x256xf32>
    %7 = arith.maximumf %3, %6 : vector<32x256xf32>
    %c2 = arith.constant 2 : index
    %c0_7 = arith.constant 0 : index
    %c0_8 = arith.constant 0 : index
    %8 = vector.load %arg1[%c2, %c0_7, %c0_8] : memref<4x144x256xf32, #tpu.memory_space<vmem>>, vector<1x144x256xf32>
    %9 = vector.shape_cast %8 : vector<1x144x256xf32> to vector<144x256xf32>
    %cst_9 = arith.constant dense<0.000000e+00> : vector<32x256xf32>
    %10 = tpu.matmul %0, %9, %cst_9 {dimension_numbers = #tpu.dot_dimension_numbers<[1], [0], [0], [1], [0, 0, 1, 1], [], []>} : vector<32x144xf32>, vector<144x256xf32>, vector<32x256xf32> -> vector<32x256xf32>
    %11 = arith.maximumf %7, %10 : vector<32x256xf32>
    %c3 = arith.constant 3 : index
    %c0_10 = arith.constant 0 : index
    %c0_11 = arith.constant 0 : index
    %12 = vector.load %arg1[%c3, %c0_10, %c0_11] : memref<4x144x256xf32, #tpu.memory_space<vmem>>, vector<1x144x256xf32>
    %13 = vector.shape_cast %12 : vector<1x144x256xf32> to vector<144x256xf32>
    %cst_12 = arith.constant dense<0.000000e+00> : vector<32x256xf32>
    %14 = tpu.matmul %0, %13, %cst_12 {dimension_numbers = #tpu.dot_dimension_numbers<[1], [0], [0], [1], [0, 0, 1, 1], [], []>} : vector<32x144xf32>, vector<144x256xf32>, vector<32x256xf32> -> vector<32x256xf32>
    %15 = arith.maximumf %11, %14 : vector<32x256xf32>
    %c0_13 = arith.constant 0 : index
    %c0_14 = arith.constant 0 : index
    %16 = vector.load %arg3[%c0_13, %c0_14] : memref<32x1xf32, #tpu.memory_space<vmem>>, vector<32x1xf32>
    %17 = vector.broadcast %16 : vector<32x1xf32> to vector<32x256xf32>
    %18 = arith.addf %15, %17 : vector<32x256xf32>
    %cst_15 = arith.constant 0.000000e+00 : f32
    %19 = vector.broadcast %cst_15 : f32 to vector<32x256xf32>
    %20 = arith.maximumf %18, %19 : vector<32x256xf32>
    %c0_16 = arith.constant 0 : index
    %c0_17 = arith.constant 0 : index
    %21 = vector.load %arg4[%c0_16, %c0_17] : memref<32x256xf32, #tpu.memory_space<vmem>>, vector<32x256xf32>
    tpu.vector_store %arg4[%c0_16, %c0_17], %20 {strides = array<i32>} : memref<32x256xf32, #tpu.memory_space<vmem>>, vector<32x256xf32>,
    return
  }
  func.func @transform_0(%arg0: i32) -> (i32, i32, i32) {
    %c0_i32 = arith.constant 0 : i32
    %c0_i32_0 = arith.constant 0 : i32
    %c0_i32_1 = arith.constant 0 : i32
    return %c0_i32, %c0_i32_0, %arg0 : i32, i32, i32
  }
  func.func @transform_1(%arg0: i32) -> (i32, i32) {
    %c0_i32 = arith.constant 0 : i32
    %c0_i32_0 = arith.constant 0 : i32
    %c0_i32_1 = arith.constant 0 : i32
    return %c0_i32, %c0_i32_0 : i32, i32
  }
  func.func @transform_2(%arg0: i32) -> (i32, i32) {
    %c0_i32 = arith.constant 0 : i32
    %c0_i32_0 = arith.constant 0 : i32
    %c0_i32_1 = arith.constant 0 : i32
    return %c0_i32, %c0_i32_0 : i32, i32
  }
  func.func @transform_3(%arg0: i32) -> (i32, i32) {
    %c0_i32 = arith.constant 0 : i32
    %c0_i32_0 = arith.constant 0 : i32
    return %c0_i32, %arg0 : i32, i32
  }
}

module attributes {stable_mosaic.version = 11 : i64} {
  func.func @_conv4_linear_kernel(%arg0: i32, %arg1: memref<16x512xf32, #tpu.memory_space<vmem>>, %arg2: memref<512x64xf32, #tpu.memory_space<vmem>>, %arg3: memref<1x64xf32, #tpu.memory_space<vmem>>, %arg4: memref<64x10xf32, #tpu.memory_space<vmem>>, %arg5: memref<1x10xf32, #tpu.memory_space<vmem>>, %arg6: memref<16x10xf32, #tpu.memory_space<vmem>>) attributes {dimension_semantics = [#tpu.dimension_semantics<parallel>], iteration_bounds = array<i64: 1>, scalar_prefetch = 0 : i64, scratch_operands = 0 : i64, tpu.core_type = #tpu.core_type<tc>, window_params = [{transform_indices = @transform_0, window_bounds = array<i64: 16, 512>}, {pipeline_mode = #tpu.pipeline_mode<synchronous>, transform_indices = @transform_1, window_bounds = array<i64: 512, 64>}, {pipeline_mode = #tpu.pipeline_mode<synchronous>, transform_indices = @transform_2, window_bounds = array<i64: 1, 64>}, {pipeline_mode = #tpu.pipeline_mode<synchronous>, transform_indices = @transform_3, window_bounds = array<i64: 64, 10>}, {pipeline_mode = #tpu.pipeline_mode<synchronous>, transform_indices = @transform_4, window_bounds = array<i64: 1, 10>}, {transform_indices = @transform_5, window_bounds = array<i64: 16, 10>}]} {
    %c0 = arith.constant 0 : index
    %c0_0 = arith.constant 0 : index
    %0 = vector.load %arg1[%c0, %c0_0] : memref<16x512xf32, #tpu.memory_space<vmem>>, vector<16x512xf32>
    %c0_1 = arith.constant 0 : index
    %c0_2 = arith.constant 0 : index
    %1 = vector.load %arg2[%c0_1, %c0_2] : memref<512x64xf32, #tpu.memory_space<vmem>>, vector<512x64xf32>
    %cst = arith.constant dense<0.000000e+00> : vector<16x64xf32>
    %2 = tpu.matmul %0, %1, %cst {dimension_numbers = #tpu.dot_dimension_numbers<[1], [0], [0], [1], [0, 0, 1, 1], [], []>} : vector<16x512xf32>, vector<512x64xf32>, vector<16x64xf32> -> vector<16x64xf32>
    %c0_3 = arith.constant 0 : index
    %c0_4 = arith.constant 0 : index
    %3 = vector.load %arg3[%c0_3, %c0_4] : memref<1x64xf32, #tpu.memory_space<vmem>>, vector<1x64xf32>
    %4 = vector.broadcast %3 : vector<1x64xf32> to vector<16x64xf32>
    %5 = arith.addf %2, %4 : vector<16x64xf32>
    %cst_5 = arith.constant 0.000000e+00 : f32
    %6 = vector.broadcast %cst_5 : f32 to vector<16x64xf32>
    %7 = arith.maximumf %5, %6 : vector<16x64xf32>
    %c0_6 = arith.constant 0 : index
    %c0_7 = arith.constant 0 : index
    %8 = vector.load %arg4[%c0_6, %c0_7] : memref<64x10xf32, #tpu.memory_space<vmem>>, vector<64x10xf32>
    %cst_8 = arith.constant dense<0.000000e+00> : vector<16x10xf32>
    %9 = tpu.matmul %7, %8, %cst_8 {dimension_numbers = #tpu.dot_dimension_numbers<[1], [0], [0], [1], [0, 0, 1, 1], [], []>} : vector<16x64xf32>, vector<64x10xf32>, vector<16x10xf32> -> vector<16x10xf32>
    %c0_9 = arith.constant 0 : index
    %c0_10 = arith.constant 0 : index
    %10 = vector.load %arg5[%c0_9, %c0_10] : memref<1x10xf32, #tpu.memory_space<vmem>>, vector<1x10xf32>
    %11 = vector.broadcast %10 : vector<1x10xf32> to vector<16x10xf32>
    %12 = arith.addf %9, %11 : vector<16x10xf32>
    %c0_11 = arith.constant 0 : index
    %c0_12 = arith.constant 0 : index
    %13 = vector.load %arg6[%c0_11, %c0_12] : memref<16x10xf32, #tpu.memory_space<vmem>>, vector<16x10xf32>
    tpu.vector_store %arg6[%c0_11, %c0_12], %12 {strides = array<i32>} : memref<16x10xf32, #tpu.memory_space<vmem>>, vector<16x10xf32>,
    return
  }
  func.func @transform_0(%arg0: i32) -> (i32, i32) {
    %c0_i32 = arith.constant 0 : i32
    %c0_i32_0 = arith.constant 0 : i32
    return %arg0, %c0_i32 : i32, i32
  }
  func.func @transform_1(%arg0: i32) -> (i32, i32) {
    %c0_i32 = arith.constant 0 : i32
    %c0_i32_0 = arith.constant 0 : i32
    %c0_i32_1 = arith.constant 0 : i32
    return %c0_i32, %c0_i32_0 : i32, i32
  }
  func.func @transform_2(%arg0: i32) -> (i32, i32) {
    %c0_i32 = arith.constant 0 : i32
    %c0_i32_0 = arith.constant 0 : i32
    %c0_i32_1 = arith.constant 0 : i32
    return %c0_i32, %c0_i32_0 : i32, i32
  }
  func.func @transform_3(%arg0: i32) -> (i32, i32) {
    %c0_i32 = arith.constant 0 : i32
    %c0_i32_0 = arith.constant 0 : i32
    %c0_i32_1 = arith.constant 0 : i32
    return %c0_i32, %c0_i32_0 : i32, i32
  }
  func.func @transform_4(%arg0: i32) -> (i32, i32) {
    %c0_i32 = arith.constant 0 : i32
    %c0_i32_0 = arith.constant 0 : i32
    %c0_i32_1 = arith.constant 0 : i32
    return %c0_i32, %c0_i32_0 : i32, i32
  }
  func.func @transform_5(%arg0: i32) -> (i32, i32) {
    %c0_i32 = arith.constant 0 : i32
    %c0_i32_0 = arith.constant 0 : i32
    return %arg0, %c0_i32 : i32, i32
  }
}

</mosaic_0001>

<bundles_post_ra>
// kernel: _lambda_.4
= control target key start
LH: loop header
LB: loop body
LE: loop exit
PB: predicated region body
PF: predicated region fallthrough
CT: control target
= control target key end

     0   :  { %s1139_s12 = smov 0   ;;  %s1141_s13 = smov 0   ;;  %s1341_s0 = inlined_call_operand.vmem [shape: f32[4,9,3584], index: 0, kind: input, shape index: {}]   ;;  %s1342_s1 = inlined_call_operand.vmem [shape: f32[8,9], index: 1, kind: input, shape index: {}]   ;;  %s1343_s2 = inlined_call_operand.vmem [shape: f32[8,1], index: 2, kind: input, shape index: {}]   ;;  %s1344_s3 = inlined_call_operand.vmem [shape: f32[8,3584], index: 3, kind: output, shape index: {}]  }
   0x1   :  { %s1143_s14 = smov 0  }
   0x2 LB: > { %s1004_s15 = sadd.s32 4294967295, %s1115_s14   ;;  %s1156_s16 = sadd.s32 1, %s1115_s14   ;;  %s1115_s14 = sphi %s1143_s14, %s1347_s14   ;;  %s1111_s13 = sphi %s1141_s13, %s1346_s13   ;;  %s1107_s12 = sphi %s1139_s12, %s1345_s12  }
   0x3   : > { %s17_s17 = ssub.s32 %s1115_s14, %s1156_s16  ;;  %s20_s18 = sadd.s32 1, %s1111_s13 }
   0x4   : > { %p18_p0 = scmp.eq.s32.totalorder %s17_s17, 0  ;;  %p27_p1 = scmp.ne.s32.totalorder %s1111_s13, %s1107_s12 }
   0x5   : > { %p28_p2 = scmp.eq.s32.totalorder %s1115_s14, 0  ;;  %p1007_p4 = scmp.ge.s32.totalorder %s1115_s14, 7 }
   0x6   : > { %s1165_s19 = scalar_select %p18_p0, %s1111_s13, %s20_s18  }
   0x7   : > { %p29_p3 = por %p28_p2, %p27_p1  ;;  %127 = sbr.rel (%p1007_p4) target bundleno = 32 (0x20), region = 24 }
   0xc   : > { %130 = sbr.rel (!%p29_p3) target bundleno = 32 (0x20), region = 28  ;;  %s132_s20 = sand.u32 (%p29_p3), 1, %s1111_s13  }
   0xd   : > { %s1065_s21 = sshll.u32 (%p29_p3), %s1115_s14, 5  ;;  %s1008_s22 = sshll.u32 (%p29_p3), %s132_s20, 8 }
   0xe   : > { %s1173_s25 = scalar_lea.vmem (%p29_p3), %s1341_s0, %s1065_s21  ;;  %s1178_s26 = scalar_lea.vmem (%p29_p3), [#allocation2], %s1008_s22 }
   0xf   : > { %v150_v0 = vld [vmem:[%s1173_s25] sm:$0xff] (%p29_p3)  ;;  %v152_v1 = vld [vmem:[%s1173_s25 + $0x8] sm:$0xff] (%p29_p3)  ;;  %v154_v2 = vld [vmem:[%s1173_s25 + $0x10] sm:$0xff] (%p29_p3) }
  0x10   : > { %151 = vst [vmem:[%s1178_s26] sm:$0xff] (%p29_p3), %v150_v0  ;;  %153 = vst [vmem:[%s1178_s26 + $0x8] sm:$0xff] (%p29_p3), %v152_v1  ;;  %v156_v3 = vld [vmem:[%s1173_s25 + $0x18] sm:$0xff] (%p29_p3)  ;;  %v158_v4 = vld [vmem:[%s1173_s25 + $0xe0] sm:$0xff] (%p29_p3) }
  0x11   : > { %155 = vst [vmem:[%s1178_s26 + $0x10] sm:$0xff] %v154_v2  ;;  %v160_v5 = vld [vmem:[%s1173_s25 + $0xe8] sm:$0xff]  ;;  %157 = vst [vmem:[%s1178_s26 + $0x18] sm:$0xff] %v156_v3  ;;  %v162_v6 = vld [vmem:[%s1173_s25 + $0xf0] sm:$0xff] }
  0x12   : > { %159 = vst [vmem:[%s1178_s26 + $0x20] sm:$0xff] %v158_v4  ;;  %161 = vst [vmem:[%s1178_s26 + $0x28] sm:$0xff] %v160_v5  ;;  %v164_v7 = vld [vmem:[%s1173_s25 + $0xf8] sm:$0xff]  ;;  %v166_v8 = vld [vmem:[%s1173_s25 + $0x1c0] sm:$0xff] }
  0x13   : > { %163 = vst [vmem:[%s1178_s26 + $0x30] sm:$0xff] %v162_v6  ;;  %165 = vst [vmem:[%s1178_s26 + $0x38] sm:$0xff] %v164_v7  ;;  %v168_v9 = vld [vmem:[%s1173_s25 + $0x1c8] sm:$0xff]  ;;  %v170_v10 = vld [vmem:[%s1173_s25 + $0x1d0] sm:$0xff] }
  0x14   : > { %167 = vst [vmem:[%s1178_s26 + $0x40] sm:$0xff] %v166_v8  ;;  %v172_v11 = vld [vmem:[%s1173_s25 + $0x1d8] sm:$0xff]  ;;  %169 = vst [vmem:[%s1178_s26 + $0x48] sm:$0xff] %v168_v9  ;;  %v174_v12 = vld [vmem:[%s1173_s25 + $0x2a0] sm:$0xff] }
  0x15   : > { %171 = vst [vmem:[%s1178_s26 + $0x50] sm:$0xff] %v170_v10  ;;  %173 = vst [vmem:[%s1178_s26 + $0x58] sm:$0xff] %v172_v11  ;;  %v176_v13 = vld [vmem:[%s1173_s25 + $0x2a8] sm:$0xff]  ;;  %v178_v14 = vld [vmem:[%s1173_s25 + $0x2b0] sm:$0xff] }
  0x16   : > { %175 = vst [vmem:[%s1178_s26 + $0x60] sm:$0xff] %v174_v12  ;;  %177 = vst [vmem:[%s1178_s26 + $0x68] sm:$0xff] %v176_v13  ;;  %v180_v15 = vld [vmem:[%s1173_s25 + $0x2b8] sm:$0xff]  ;;  %v182_v16 = vld [vmem:[%s1173_s25 + $0x380] sm:$0xff] }
  0x17   : > { %179 = vst [vmem:[%s1178_s26 + $0x70] sm:$0xff] %v178_v14  ;;  %v184_v17 = vld [vmem:[%s1173_s25 + $0x388] sm:$0xff]  ;;  %181 = vst [vmem:[%s1178_s26 + $0x78] sm:$0xff] %v180_v15  ;;  %v186_v18 = vld [vmem:[%s1173_s25 + $0x390] sm:$0xff] }
  0x18   : > { %183 = vst [vmem:[%s1178_s26 + $0x80] sm:$0xff] %v182_v16  ;;  %185 = vst [vmem:[%s1178_s26 + $0x88] sm:$0xff] %v184_v17  ;;  %v188_v19 = vld [vmem:[%s1173_s25 + $0x398] sm:$0xff]  ;;  %v190_v20 = vld [vmem:[%s1173_s25 + $0x460] sm:$0xff] }
  0x19   : > { %187 = vst [vmem:[%s1178_s26 + $0x90] sm:$0xff] %v186_v18  ;;  %189 = vst [vmem:[%s1178_s26 + $0x98] sm:$0xff] %v188_v19  ;;  %v192_v21 = vld [vmem:[%s1173_s25 + $0x468] sm:$0xff]  ;;  %v194_v22 = vld [vmem:[%s1173_s25 + $0x470] sm:$0xff] }
  0x1a   : > { %191 = vst [vmem:[%s1178_s26 + $0xa0] sm:$0xff] %v190_v20  ;;  %v196_v23 = vld [vmem:[%s1173_s25 + $0x478] sm:$0xff]  ;;  %193 = vst [vmem:[%s1178_s26 + $0xa8] sm:$0xff] %v192_v21  ;;  %v198_v24 = vld [vmem:[%s1173_s25 + $0x540] sm:$0xff] }
  0x1b   : > { %195 = vst [vmem:[%s1178_s26 + $0xb0] sm:$0xff] %v194_v22  ;;  %197 = vst [vmem:[%s1178_s26 + $0xb8] sm:$0xff] %v196_v23  ;;  %v200_v25 = vld [vmem:[%s1173_s25 + $0x548] sm:$0xff]  ;;  %v202_v26 = vld [vmem:[%s1173_s25 + $0x550] sm:$0xff] }
  0x1c   : > { %199 = vst [vmem:[%s1178_s26 + $0xc0] sm:$0xff] %v198_v24  ;;  %201 = vst [vmem:[%s1178_s26 + $0xc8] sm:$0xff] %v200_v25  ;;  %v204_v27 = vld [vmem:[%s1173_s25 + $0x558] sm:$0xff]  ;;  %v206_v28 = vld [vmem:[%s1173_s25 + $0x620] sm:$0xff] }
  0x1d   : > { %203 = vst [vmem:[%s1178_s26 + $0xd0] sm:$0xff] %v202_v26  ;;  %v208_v29 = vld [vmem:[%s1173_s25 + $0x628] sm:$0xff]  ;;  %205 = vst [vmem:[%s1178_s26 + $0xd8] sm:$0xff] %v204_v27  ;;  %v210_v30 = vld [vmem:[%s1173_s25 + $0x630] sm:$0xff] }
  0x1e   : > { %207 = vst [vmem:[%s1178_s26 + $0xe0] sm:$0xff] %v206_v28  ;;  %209 = vst [vmem:[%s1178_s26 + $0xe8] sm:$0xff] %v208_v29  ;;  %v212_v31 = vld [vmem:[%s1173_s25 + $0x638] sm:$0xff] }
  0x1f   : > { %211 = vst [vmem:[%s1178_s26 + $0xf0] sm:$0xff] %v210_v30  ;;  %213 = vst [vmem:[%s1178_s26 + $0xf8] sm:$0xff] %v212_v31 }
  0x20 PF: > { %p1011_p5 = scmp.ge.s32.totalorder %s1115_s14, 1  ;;  %p218_p6 = scmp.lt.s32.totalorder %s1115_s14, 8 }
  0x22   : > { %p219_p7 = pnand %p1011_p5, %p218_p6 }
  0x23   : > { %s225_s27 = sand.u32 (!%p219_p7), 1, %s1107_s12   ;;  %s1013_s7 = sshll.u32 (!%p219_p7), %s1004_s15, 2 }
  0x24   : > { %222 = sbr.rel (%p219_p7) target bundleno = 268 (0x10c), region = 51  ;;  %s1012_s28 = sshll.u32 (!%p219_p7), %s225_s27, 8 }
  0x25   : > { %s1249_s4 = scalar_lea.vmem (!%p219_p7), [#allocation2], %s1012_s28  ;;  %p250_p8 = scmp.lt.s32.totalorder (!%p219_p7), %s1013_s7, 27 }
  0x29   : > { %vm268_vm0 = vcmask 1040384   ;;  %v1117_v32 = vmov 0.0   ;;  %v924_v33 = vld [vmem:[%s1343_s2] sm:$0xff]  ;;  %v1118_v34 = vmov 0   ;;  %v261_v35 = vld [vmem:[%s1249_s4 + $0x28] sm:$0x1] }
  0x2a   : > { %345 = vmatprep.mubr.f32.mxu0 %v1117_v32  ;;  %416 = vmatprep.mubr.f32.mxu1 %v1117_v32  ;;  %v263_v36 = vld [vmem:[%s1249_s4 + $0x38] sm:$0x1]  ;;  %v260_v37 = vld [vmem:[%s1249_s4 + $0x20] sm:$0x1]  ;;  %v262_v38 = vld [vmem:[%s1249_s4 + $0x30] sm:$0x1] }
  0x2b   : > { %1092 = vset.pattern.permute.xlu0 %v1118_v34  ;;  %1015 = vmatprep.subr.msk.mxu0 %vm268_vm0, %v261_v35  ;;  %v257_v39 = vld [vmem:[%s1249_s4 + $0x8] sm:$0xff]  ;;  %v259_v40 = vld [vmem:[%s1249_s4 + $0x18] sm:$0xff]  ;;  %v256_v41 = vld [vmem:[%s1249_s4] sm:$0xff]  ;;  %vm264_vm1 = vcmask 72704   ;;  %s1349_s7 = smov (!%p250_p8, %s1013_s7), 27 }
  0x2c   : > { %927 = vperm.xlu0 %1092, %v924_v33   ;;  %1018 = vmatprep.subr.msk.mxu1 %vm268_vm0, %v263_v36  ;;  %v258_v42 = vld [vmem:[%s1249_s4 + $0x10] sm:$0xff]  ;;  %v1266_v43 = vld [vmem:[%s1342_s1] sm:$0xff]  ;;  %v1026_v44 = vld [vmem:[%s1249_s4 + $0x68] sm:$0x1]  ;;  %s1014_s8 = sshll.u32 %s1349_s7, 3 }
  0x2d   : > { %1016 = vmatpush1.msk.msra.mxu0 %vm268_vm0, %v260_v37  ;;  %1019 = vmatpush1.msk.msra.mxu1 %vm268_vm0, %v262_v38  ;;  %v1028_v45 = vld [vmem:[%s1249_s4 + $0x78] sm:$0x1]  ;;  %v1025_v46 = vld [vmem:[%s1249_s4 + $0x60] sm:$0x1]  ;;  %v1027_v47 = vld [vmem:[%s1249_s4 + $0x70] sm:$0x1]  ;;  %s253_s11 = scalar_lea.vmem %s1344_s3, %s1014_s8 }
  0x2e   : > { %311 = vmatprep.subr.mxu0 %v257_v39  ;;  %382 = vmatprep.subr.mxu1 %v259_v40  ;;  %v1022_v48 = vld [vmem:[%s1249_s4 + $0x48] sm:$0xff]  ;;  %v1024_v49 = vld [vmem:[%s1249_s4 + $0x58] sm:$0xff]  ;;  %v1021_v50 = vld [vmem:[%s1249_s4 + $0x40] sm:$0xff] }
  0x2f   : > { %312 = vmatpush1.msra.mxu0 %v256_v41  ;;  %383 = vmatpush1.msra.mxu1 %v258_v42  ;;  %v1023_v51 = vld [vmem:[%s1249_s4 + $0x50] sm:$0xff]  ;;  %v1040_v52 = vld [vmem:[%s1249_s4 + $0xa8] sm:$0x1]  ;;  %v1042_v53 = vld [vmem:[%s1249_s4 + $0xb8] sm:$0x1] }
  0x30   : > { %1017 = vmatmul.mubr.msk.f32.vlgmr.msra.gmra.mxu0 %vm264_vm1, %v1266_v43  ;;  %1020 = vmatmul.mubr.msk.f32.vlgmr.msra.gmra.mxu1 %vm264_vm1, %v1266_v43  ;;  %v1039_v54 = vld [vmem:[%s1249_s4 + $0xa0] sm:$0x1]  ;;  %v1041_v55 = vld [vmem:[%s1249_s4 + $0xb0] sm:$0x1]  ;;  %v1036_v56 = vld [vmem:[%s1249_s4 + $0x88] sm:$0xff] }
  0x31   : > { %1029 = vmatprep.subr.msk.mxu0 %vm268_vm0, %v1026_v44  ;;  %1032 = vmatprep.subr.msk.mxu1 %vm268_vm0, %v1028_v45  ;;  %v1038_v57 = vld [vmem:[%s1249_s4 + $0x98] sm:$0xff]  ;;  %v1035_v58 = vld [vmem:[%s1249_s4 + $0x80] sm:$0xff]  ;;  %v1037_v59 = vld [vmem:[%s1249_s4 + $0x90] sm:$0xff] }
  0x32   : > { %1030 = vmatpush1.msk.msra.mxu0 %vm268_vm0, %v1025_v46  ;;  %1033 = vmatpush1.msk.msra.mxu1 %vm268_vm0, %v1027_v47  ;;  %v1054_v60 = vld [vmem:[%s1249_s4 + $0xe8] sm:$0x1]  ;;  %v1056_v61 = vld [vmem:[%s1249_s4 + $0xf8] sm:$0x1]  ;;  %v1053_v62 = vld [vmem:[%s1249_s4 + $0xe0] sm:$0x1] }
  0x33   : > { %474 = vmatprep.subr.mxu0 %v1022_v48  ;;  %545 = vmatprep.subr.mxu1 %v1024_v49  ;;  %v1055_v63 = vld [vmem:[%s1249_s4 + $0xf0] sm:$0x1]  ;;  %v1050_v0 = vld [vmem:[%s1249_s4 + $0xc8] sm:$0xff]  ;;  %v1052_v1 = vld [vmem:[%s1249_s4 + $0xd8] sm:$0xff] }
  0x34   : > { %475 = vmatpush1.msra.mxu0 %v1021_v50  ;;  %508 = vmatprep.mubr.f32.mxu0 %v1117_v32  ;;  %v1049_v2 = vld [vmem:[%s1249_s4 + $0xc0] sm:$0xff]  ;;  %v1051_v3 = vld [vmem:[%s1249_s4 + $0xd0] sm:$0xff] }
  0x35   : > { %546 = vmatpush1.msra.mxu1 %v1023_v51  ;;  %579 = vmatprep.mubr.f32.mxu1 %v1117_v32 }
  0x36   : > { %1031 = vmatmul.mubr.msk.f32.vlgmr.msra.gmra.mxu0 %vm264_vm1, %v1266_v43  ;;  %1034 = vmatmul.mubr.msk.f32.vlgmr.msra.gmra.mxu1 %vm264_vm1, %v1266_v43 }
  0x37   : > { %1043 = vmatprep.subr.msk.mxu0 %vm268_vm0, %v1040_v52  ;;  %1046 = vmatprep.subr.msk.mxu1 %vm268_vm0, %v1042_v53 }
  0x38   : > { %1044 = vmatpush1.msk.msra.mxu0 %vm268_vm0, %v1039_v54  ;;  %1047 = vmatpush1.msk.msra.mxu1 %vm268_vm0, %v1041_v55 }
  0x39   : > { %641 = vmatprep.subr.mxu0 %v1036_v56  ;;  %712 = vmatprep.subr.mxu1 %v1038_v57 }
  0x3a   : > { %642 = vmatpush1.msra.mxu0 %v1035_v58  ;;  %675 = vmatprep.mubr.f32.mxu0 %v1117_v32 }
  0x3b   : > { %713 = vmatpush1.msra.mxu1 %v1037_v59  ;;  %746 = vmatprep.mubr.f32.mxu1 %v1117_v32 }
  0x3c   : > { %1045 = vmatmul.mubr.msk.f32.vlgmr.msra.gmra.mxu0 %vm264_vm1, %v1266_v43  ;;  %1048 = vmatmul.mubr.msk.f32.vlgmr.msra.gmra.mxu1 %vm264_vm1, %v1266_v43 }
  0x3d   : > { %1057 = vmatprep.subr.msk.mxu0 %vm268_vm0, %v1054_v60  ;;  %1060 = vmatprep.subr.msk.mxu1 %vm268_vm0, %v1056_v61 }
  0x3e   : > { %1058 = vmatpush1.msk.msra.mxu0 %vm268_vm0, %v1053_v62  ;;  %1061 = vmatpush1.msk.msra.mxu1 %vm268_vm0, %v1055_v63 }
  0x3f   : > { %808 = vmatprep.subr.mxu0 %v1050_v0  ;;  %879 = vmatprep.subr.mxu1 %v1052_v1 }
  0x40   : > { %809 = vmatpush1.msra.mxu0 %v1049_v2  ;;  %842 = vmatprep.mubr.f32.mxu0 %v1117_v32 }
  0x41   : > { %880 = vmatpush1.msra.mxu1 %v1051_v3  ;;  %913 = vmatprep.mubr.f32.mxu1 %v1117_v32 }
  0x42   : > { %1059 = vmatmul.mubr.msk.f32.vlgmr.msra.gmra.mxu0 %vm264_vm1, %v1266_v43  ;;  %1062 = vmatmul.mubr.msk.f32.vlgmr.msra.gmra.mxu1 %vm264_vm1, %v1266_v43 }
  0xa7   : > { %v928_v22 = vpop.permute.xlu0 %927 }
  0xf0   : > { %v347_v4 = vpop.f32.mrf.mxu0  ;;  %v418_v5 = vpop.f32.mrf.mxu1 }
  0xf2   : > { %v349_v6 = vpop.f32.mrf.mxu0  ;;  %v420_v7 = vpop.f32.mrf.mxu1 }
  0xf6   : > { %v510_v8 = vpop.f32.mrf.mxu0  ;;  %v581_v9 = vpop.f32.mrf.mxu1 }
  0xf7   : > { %v586_v16 = vmax.f32 %v347_v4, %v510_v8  ;;  %v588_v17 = vmax.f32 %v418_v5, %v581_v9 }
  0xf8   : > { %v512_v10 = vpop.f32.mrf.mxu0  ;;  %v583_v11 = vpop.f32.mrf.mxu1 }
  0xf9   : > { %v587_v18 = vmax.f32 %v349_v6, %v512_v10  ;;  %v589_v19 = vmax.f32 %v420_v7, %v583_v11 }
  0xfc   : > { %v677_v12 = vpop.f32.mrf.mxu0  ;;  %v748_v13 = vpop.f32.mrf.mxu1 }
  0xfd   : > { %v753_v20 = vmax.f32 %v586_v16, %v677_v12  ;;  %v755_v21 = vmax.f32 %v588_v17, %v748_v13 }
  0xfe   : > { %v679_v14 = vpop.f32.mrf.mxu0  ;;  %v750_v15 = vpop.f32.mrf.mxu1 }
  0xff   : > { %v754_v25 = vmax.f32 %v587_v18, %v679_v14  ;;  %v756_v26 = vmax.f32 %v589_v19, %v750_v15 }
 0x102   : > { %v844_v23 = vpop.f32.mrf.mxu0  ;;  %v915_v24 = vpop.f32.mrf.mxu1 }
 0x103   : > { %v920_v27 = vmax.f32 %v753_v20, %v844_v23  ;;  %v922_v28 = vmax.f32 %v755_v21, %v915_v24 }
 0x104   : > { %v846_v29 = vpop.f32.mrf.mxu0  ;;  %v917_v30 = vpop.f32.mrf.mxu1 }
 0x105   : > { %v930_v31 = vadd.f32 %v928_v22, %v920_v27  ;;  %v932_v32 = vadd.f32 %v928_v22, %v922_v28  ;;  %v921_v33 = vmax.f32 %v754_v25, %v846_v29  ;;  %v923_v34 = vmax.f32 %v756_v26, %v917_v30 }
 0x107   : > { %v934_v35 = vmax.f32 %v930_v31, 0.0  ;;  %v936_v36 = vmax.f32 %v932_v32, 0.0  ;;  %v931_v37 = vadd.f32 %v928_v22, %v921_v33  ;;  %v933_v38 = vadd.f32 %v928_v22, %v923_v34 }
 0x109   : > { %938 = vst [vmem:[%s253_s11] sm:$0xff] %v934_v35  ;;  %940 = vst [vmem:[%s253_s11 + $0x10] sm:$0xff] %v936_v36  ;;  %v935_v39 = vmax.f32 %v931_v37, 0.0  ;;  %v937_v40 = vmax.f32 %v933_v38, 0.0 }
 0x10b   : > { %939 = vst [vmem:[%s253_s11 + $0x8] sm:$0xff] %v935_v39  ;;  %941 = vst [vmem:[%s253_s11 + $0x18] sm:$0xff] %v937_v40 }
 0x10c PF: > { %p10_p9 = scmp.ge.s32.totalorder %s1156_s16, 9   ;;  %s1345_s12 = smov %s1111_s13 }
 0x10d   : > { %s1346_s13 = smov %s1165_s19  ;;  %s1347_s14 = smov %s1156_s16 }
 0x10e   :  { %12 = sbr.rel (!%p10_p9) target bundleno = 2 (0x2), region = 93 }

// kernel: _lambda_.5
= control target key start
LH: loop header
LB: loop body
LE: loop exit
PB: predicated region body
PF: predicated region fallthrough
CT: control target
= control target key end

     0   :  { %s1616_s12 = smov 0   ;;  %s1618_s13 = smov 0   ;;  %s2200_s0 = inlined_call_operand.vmem [shape: f32[4,72,1024], index: 0, kind: input, shape index: {}]   ;;  %s2201_s1 = inlined_call_operand.vmem [shape: f32[16,72], index: 1, kind: input, shape index: {}]   ;;  %s2202_s2 = inlined_call_operand.vmem [shape: f32[16,1], index: 2, kind: input, shape index: {}]   ;;  %s2203_s3 = inlined_call_operand.vmem [shape: f32[16,1024], index: 3, kind: output, shape index: {}]  }
   0x1   :  { %s1620_s14 = smov 0  }
   0x2 LB: > { %s1402_s15 = sadd.s32 4294967295, %s1592_s14   ;;  %s1633_s16 = sadd.s32 1, %s1592_s14   ;;  %s1592_s14 = sphi %s1620_s14, %s2207_s14   ;;  %s1588_s13 = sphi %s1618_s13, %s2206_s13   ;;  %s1584_s12 = sphi %s1616_s12, %s2205_s12  }
   0x3   : > { %s17_s17 = ssub.s32 %s1592_s14, %s1633_s16  ;;  %s20_s18 = sadd.s32 1, %s1588_s13 }
   0x4   : > { %p18_p0 = scmp.eq.s32.totalorder %s17_s17, 0  ;;  %p27_p1 = scmp.ne.s32.totalorder %s1588_s13, %s1584_s12 }
   0x5   : > { %p28_p2 = scmp.eq.s32.totalorder %s1592_s14, 0  ;;  %p99_p3 = scmp.eq.s32.totalorder %s1402_s15, 1 }
   0x6   : > { %s1644_s19 = scalar_select %p18_p0, %s1588_s13, %s20_s18  }
   0x7   : > { %p29_p4 = por %p28_p2, %p27_p1  ;;  %p1646_p5 = por %p99_p3, %p27_p1 }
   0x8   : > { %p1405_p6 = scmp.ge.s32.totalorder %s1592_s14, 2 }
   0xa   : > { %127 = sbr.rel (%p1405_p6) target bundleno = 92 (0x5c), region = 24 }
   0xf   : > { %130 = sbr.rel (!%p29_p4) target bundleno = 92 (0x5c), region = 28  ;;  %s132_s21 = sand.u32 (%p29_p4), 1, %s1588_s13  }
  0x10   : > { %s1539_s22 = sshll.u32 (%p29_p4), %s1592_s14, 5  ;;  %s1541_s23 = smul.u32 (%p29_p4), 1152, %s132_s21 }
  0x11   : > { %s1656_s26 = scalar_lea.vmem (%p29_p4), %s2200_s0, %s1539_s22 }
  0x12   : > { %v150_v0 = vld [vmem:[%s1656_s26] sm:$0xff] (%p29_p4)  ;;  %v152_v1 = vld [vmem:[%s1656_s26 + $0x8] sm:$0xff] (%p29_p4)  ;;  %v154_v2 = vld [vmem:[%s1656_s26 + $0x10] sm:$0xff] (%p29_p4)  ;;  %s1664_s27 = scalar_lea.vmem (%p29_p4), [#allocation2], %s1541_s23 }
  0x13   : > { %v156_v3 = vld [vmem:[%s1656_s26 + $0x18] sm:$0xff] (%p29_p4)  ;;  %v158_v4 = vld [vmem:[%s1656_s26 + $0x40] sm:$0xff] (%p29_p4)  ;;  %v160_v5 = vld [vmem:[%s1656_s26 + $0x48] sm:$0xff] (%p29_p4)  ;;  %151 = vst [vmem:[%s1664_s27] sm:$0xff] (%p29_p4), %v150_v0 }
  0x14   : > { %153 = vst [vmem:[%s1664_s27 + $0x8] sm:$0xff] %v152_v1  ;;  %155 = vst [vmem:[%s1664_s27 + $0x10] sm:$0xff] %v154_v2  ;;  %v162_v6 = vld [vmem:[%s1656_s26 + $0x50] sm:$0xff]  ;;  %v164_v7 = vld [vmem:[%s1656_s26 + $0x58] sm:$0xff] }
  0x15   : > { %157 = vst [vmem:[%s1664_s27 + $0x18] sm:$0xff] %v156_v3  ;;  %159 = vst [vmem:[%s1664_s27 + $0x20] sm:$0xff] %v158_v4  ;;  %v166_v8 = vld [vmem:[%s1656_s26 + $0x80] sm:$0xff]  ;;  %v168_v9 = vld [vmem:[%s1656_s26 + $0x88] sm:$0xff] }
  0x16   : > { %161 = vst [vmem:[%s1664_s27 + $0x28] sm:$0xff] %v160_v5  ;;  %163 = vst [vmem:[%s1664_s27 + $0x30] sm:$0xff] %v162_v6  ;;  %v170_v10 = vld [vmem:[%s1656_s26 + $0x90] sm:$0xff]  ;;  %v172_v11 = vld [vmem:[%s1656_s26 + $0x98] sm:$0xff] }
  0x17   : > { %165 = vst [vmem:[%s1664_s27 + $0x38] sm:$0xff] %v164_v7  ;;  %167 = vst [vmem:[%s1664_s27 + $0x40] sm:$0xff] %v166_v8  ;;  %v174_v12 = vld [vmem:[%s1656_s26 + $0xc0] sm:$0xff]  ;;  %v176_v13 = vld [vmem:[%s1656_s26 + $0xc8] sm:$0xff] }
  0x18   : > { %169 = vst [vmem:[%s1664_s27 + $0x48] sm:$0xff] %v168_v9  ;;  %171 = vst [vmem:[%s1664_s27 + $0x50] sm:$0xff] %v170_v10  ;;  %v178_v14 = vld [vmem:[%s1656_s26 + $0xd0] sm:$0xff]  ;;  %v180_v15 = vld [vmem:[%s1656_s26 + $0xd8] sm:$0xff] }
  0x19   : > { %173 = vst [vmem:[%s1664_s27 + $0x58] sm:$0xff] %v172_v11  ;;  %175 = vst [vmem:[%s1664_s27 + $0x60] sm:$0xff] %v174_v12  ;;  %v182_v16 = vld [vmem:[%s1656_s26 + $0x100] sm:$0xff]  ;;  %v184_v17 = vld [vmem:[%s1656_s26 + $0x108] sm:$0xff] }
  0x1a   : > { %177 = vst [vmem:[%s1664_s27 + $0x68] sm:$0xff] %v176_v13  ;;  %179 = vst [vmem:[%s1664_s27 + $0x70] sm:$0xff] %v178_v14  ;;  %v186_v18 = vld [vmem:[%s1656_s26 + $0x110] sm:$0xff]  ;;  %v188_v19 = vld [vmem:[%s1656_s26 + $0x118] sm:$0xff] }
  0x1b   : > { %181 = vst [vmem:[%s1664_s27 + $0x78] sm:$0xff] %v180_v15  ;;  %183 = vst [vmem:[%s1664_s27 + $0x80] sm:$0xff] %v182_v16  ;;  %v190_v20 = vld [vmem:[%s1656_s26 + $0x140] sm:$0xff]  ;;  %v192_v21 = vld [vmem:[%s1656_s26 + $0x148] sm:$0xff] }
  0x1c   : > { %185 = vst [vmem:[%s1664_s27 + $0x88] sm:$0xff] %v184_v17  ;;  %187 = vst [vmem:[%s1664_s27 + $0x90] sm:$0xff] %v186_v18  ;;  %v194_v22 = vld [vmem:[%s1656_s26 + $0x150] sm:$0xff]  ;;  %v196_v23 = vld [vmem:[%s1656_s26 + $0x158] sm:$0xff] }
  0x1d   : > { %189 = vst [vmem:[%s1664_s27 + $0x98] sm:$0xff] %v188_v19  ;;  %191 = vst [vmem:[%s1664_s27 + $0xa0] sm:$0xff] %v190_v20  ;;  %v198_v24 = vld [vmem:[%s1656_s26 + $0x180] sm:$0xff]  ;;  %v200_v25 = vld [vmem:[%s1656_s26 + $0x188] sm:$0xff] }
  0x1e   : > { %193 = vst [vmem:[%s1664_s27 + $0xa8] sm:$0xff] %v192_v21  ;;  %195 = vst [vmem:[%s1664_s27 + $0xb0] sm:$0xff] %v194_v22  ;;  %v202_v26 = vld [vmem:[%s1656_s26 + $0x190] sm:$0xff]  ;;  %v204_v27 = vld [vmem:[%s1656_s26 + $0x198] sm:$0xff] }
  0x1f   : > { %197 = vst [vmem:[%s1664_s27 + $0xb8] sm:$0xff] %v196_v23  ;;  %199 = vst [vmem:[%s1664_s27 + $0xc0] sm:$0xff] %v198_v24  ;;  %v206_v28 = vld [vmem:[%s1656_s26 + $0x1c0] sm:$0xff]  ;;  %v208_v29 = vld [vmem:[%s1656_s26 + $0x1c8] sm:$0xff] }
  0x20   : > { %201 = vst [vmem:[%s1664_s27 + $0xc8] sm:$0xff] %v200_v25  ;;  %203 = vst [vmem:[%s1664_s27 + $0xd0] sm:$0xff] %v202_v26  ;;  %v210_v30 = vld [vmem:[%s1656_s26 + $0x1d0] sm:$0xff]  ;;  %v212_v31 = vld [vmem:[%s1656_s26 + $0x1d8] sm:$0xff] }
  0x21   : > { %205 = vst [vmem:[%s1664_s27 + $0xd8] sm:$0xff] %v204_v27  ;;  %207 = vst [vmem:[%s1664_s27 + $0xe0] sm:$0xff] %v206_v28  ;;  %v214_v32 = vld [vmem:[%s1656_s26 + $0x200] sm:$0xff]  ;;  %v216_v33 = vld [vmem:[%s1656_s26 + $0x208] sm:$0xff] }
  0x22   : > { %209 = vst [vmem:[%s1664_s27 + $0xe8] sm:$0xff] %v208_v29  ;;  %211 = vst [vmem:[%s1664_s27 + $0xf0] sm:$0xff] %v210_v30  ;;  %v218_v34 = vld [vmem:[%s1656_s26 + $0x210] sm:$0xff]  ;;  %v220_v35 = vld [vmem:[%s1656_s26 + $0x218] sm:$0xff] }
  0x23   : > { %213 = vst [vmem:[%s1664_s27 + $0xf8] sm:$0xff] %v212_v31  ;;  %215 = vst [vmem:[%s1664_s27 + $0x100] sm:$0xff] %v214_v32  ;;  %v222_v36 = vld [vmem:[%s1656_s26 + $0x240] sm:$0xff]  ;;  %v224_v37 = vld [vmem:[%s1656_s26 + $0x248] sm:$0xff] }
  0x24   : > { %217 = vst [vmem:[%s1664_s27 + $0x108] sm:$0xff] %v216_v33  ;;  %219 = vst [vmem:[%s1664_s27 + $0x110] sm:$0xff] %v218_v34  ;;  %v226_v38 = vld [vmem:[%s1656_s26 + $0x250] sm:$0xff]  ;;  %v228_v39 = vld [vmem:[%s1656_s26 + $0x258] sm:$0xff] }
  0x25   : > { %221 = vst [vmem:[%s1664_s27 + $0x118] sm:$0xff] %v220_v35  ;;  %223 = vst [vmem:[%s1664_s27 + $0x120] sm:$0xff] %v222_v36  ;;  %v230_v40 = vld [vmem:[%s1656_s26 + $0x280] sm:$0xff]  ;;  %v232_v41 = vld [vmem:[%s1656_s26 + $0x288] sm:$0xff] }
  0x26   : > { %225 = vst [vmem:[%s1664_s27 + $0x128] sm:$0xff] %v224_v37  ;;  %227 = vst [vmem:[%s1664_s27 + $0x130] sm:$0xff] %v226_v38  ;;  %v234_v42 = vld [vmem:[%s1656_s26 + $0x290] sm:$0xff]  ;;  %v236_v43 = vld [vmem:[%s1656_s26 + $0x298] sm:$0xff] }
  0x27   : > { %229 = vst [vmem:[%s1664_s27 + $0x138] sm:$0xff] %v228_v39  ;;  %231 = vst [vmem:[%s1664_s27 + $0x140] sm:$0xff] %v230_v40  ;;  %v238_v44 = vld [vmem:[%s1656_s26 + $0x2c0] sm:$0xff]  ;;  %v240_v45 = vld [vmem:[%s1656_s26 + $0x2c8] sm:$0xff] }
  0x28   : > { %233 = vst [vmem:[%s1664_s27 + $0x148] sm:$0xff] %v232_v41  ;;  %235 = vst [vmem:[%s1664_s27 + $0x150] sm:$0xff] %v234_v42  ;;  %v242_v46 = vld [vmem:[%s1656_s26 + $0x2d0] sm:$0xff]  ;;  %v244_v47 = vld [vmem:[%s1656_s26 + $0x2d8] sm:$0xff] }
  0x29   : > { %237 = vst [vmem:[%s1664_s27 + $0x158] sm:$0xff] %v236_v43  ;;  %239 = vst [vmem:[%s1664_s27 + $0x160] sm:$0xff] %v238_v44  ;;  %v246_v48 = vld [vmem:[%s1656_s26 + $0x300] sm:$0xff]  ;;  %v248_v49 = vld [vmem:[%s1656_s26 + $0x308] sm:$0xff] }
  0x2a   : > { %241 = vst [vmem:[%s1664_s27 + $0x168] sm:$0xff] %v240_v45  ;;  %243 = vst [vmem:[%s1664_s27 + $0x170] sm:$0xff] %v242_v46  ;;  %v250_v50 = vld [vmem:[%s1656_s26 + $0x310] sm:$0xff]  ;;  %v252_v51 = vld [vmem:[%s1656_s26 + $0x318] sm:$0xff] }
  0x2b   : > { %245 = vst [vmem:[%s1664_s27 + $0x178] sm:$0xff] %v244_v47  ;;  %247 = vst [vmem:[%s1664_s27 + $0x180] sm:$0xff] %v246_v48  ;;  %v254_v52 = vld [vmem:[%s1656_s26 + $0x340] sm:$0xff]  ;;  %v256_v53 = vld [vmem:[%s1656_s26 + $0x348] sm:$0xff] }
  0x2c   : > { %249 = vst [vmem:[%s1664_s27 + $0x188] sm:$0xff] %v248_v49  ;;  %251 = vst [vmem:[%s1664_s27 + $0x190] sm:$0xff] %v250_v50  ;;  %v258_v54 = vld [vmem:[%s1656_s26 + $0x350] sm:$0xff]  ;;  %v260_v55 = vld [vmem:[%s1656_s26 + $0x358] sm:$0xff] }
  0x2d   : > { %253 = vst [vmem:[%s1664_s27 + $0x198] sm:$0xff] %v252_v51  ;;  %255 = vst [vmem:[%s1664_s27 + $0x1a0] sm:$0xff] %v254_v52  ;;  %v262_v56 = vld [vmem:[%s1656_s26 + $0x380] sm:$0xff]  ;;  %v264_v57 = vld [vmem:[%s1656_s26 + $0x388] sm:$0xff] }
  0x2e   : > { %257 = vst [vmem:[%s1664_s27 + $0x1a8] sm:$0xff] %v256_v53  ;;  %259 = vst [vmem:[%s1664_s27 + $0x1b0] sm:$0xff] %v258_v54  ;;  %v266_v58 = vld [vmem:[%s1656_s26 + $0x390] sm:$0xff]  ;;  %v268_v59 = vld [vmem:[%s1656_s26 + $0x398] sm:$0xff] }
  0x2f   : > { %261 = vst [vmem:[%s1664_s27 + $0x1b8] sm:$0xff] %v260_v55  ;;  %263 = vst [vmem:[%s1664_s27 + $0x1c0] sm:$0xff] %v262_v56  ;;  %v270_v60 = vld [vmem:[%s1656_s26 + $0x3c0] sm:$0xff]  ;;  %v272_v61 = vld [vmem:[%s1656_s26 + $0x3c8] sm:$0xff] }
  0x30   : > { %265 = vst [vmem:[%s1664_s27 + $0x1c8] sm:$0xff] %v264_v57  ;;  %267 = vst [vmem:[%s1664_s27 + $0x1d0] sm:$0xff] %v266_v58  ;;  %v274_v62 = vld [vmem:[%s1656_s26 + $0x3d0] sm:$0xff]  ;;  %v276_v63 = vld [vmem:[%s1656_s26 + $0x3d8] sm:$0xff] }
  0x31   : > { %269 = vst [vmem:[%s1664_s27 + $0x1d8] sm:$0xff] %v268_v59  ;;  %271 = vst [vmem:[%s1664_s27 + $0x1e0] sm:$0xff] %v270_v60  ;;  %v278_v0 = vld [vmem:[%s1656_s26 + $0x400] sm:$0xff]  ;;  %v280_v1 = vld [vmem:[%s1656_s26 + $0x408] sm:$0xff] }
  0x32   : > { %273 = vst [vmem:[%s1664_s27 + $0x1e8] sm:$0xff] %v272_v61  ;;  %275 = vst [vmem:[%s1664_s27 + $0x1f0] sm:$0xff] %v274_v62  ;;  %v282_v2 = vld [vmem:[%s1656_s26 + $0x410] sm:$0xff]  ;;  %v284_v3 = vld [vmem:[%s1656_s26 + $0x418] sm:$0xff] }
  0x33   : > { %277 = vst [vmem:[%s1664_s27 + $0x1f8] sm:$0xff] %v276_v63  ;;  %279 = vst [vmem:[%s1664_s27 + $0x200] sm:$0xff] %v278_v0  ;;  %v286_v4 = vld [vmem:[%s1656_s26 + $0x440] sm:$0xff]  ;;  %v288_v5 = vld [vmem:[%s1656_s26 + $0x448] sm:$0xff] }
  0x34   : > { %281 = vst [vmem:[%s1664_s27 + $0x208] sm:$0xff] %v280_v1  ;;  %283 = vst [vmem:[%s1664_s27 + $0x210] sm:$0xff] %v282_v2  ;;  %v290_v6 = vld [vmem:[%s1656_s26 + $0x450] sm:$0xff]  ;;  %v292_v7 = vld [vmem:[%s1656_s26 + $0x458] sm:$0xff] }
  0x35   : > { %285 = vst [vmem:[%s1664_s27 + $0x218] sm:$0xff] %v284_v3  ;;  %287 = vst [vmem:[%s1664_s27 + $0x220] sm:$0xff] %v286_v4  ;;  %v294_v8 = vld [vmem:[%s1656_s26 + $0x480] sm:$0xff]  ;;  %v296_v9 = vld [vmem:[%s1656_s26 + $0x488] sm:$0xff] }
  0x36   : > { %289 = vst [vmem:[%s1664_s27 + $0x228] sm:$0xff] %v288_v5  ;;  %291 = vst [vmem:[%s1664_s27 + $0x230] sm:$0xff] %v290_v6  ;;  %v298_v10 = vld [vmem:[%s1656_s26 + $0x490] sm:$0xff]  ;;  %v300_v11 = vld [vmem:[%s1656_s26 + $0x498] sm:$0xff] }
  0x37   : > { %293 = vst [vmem:[%s1664_s27 + $0x238] sm:$0xff] %v292_v7  ;;  %295 = vst [vmem:[%s1664_s27 + $0x240] sm:$0xff] %v294_v8  ;;  %v302_v12 = vld [vmem:[%s1656_s26 + $0x4c0] sm:$0xff]  ;;  %v304_v13 = vld [vmem:[%s1656_s26 + $0x4c8] sm:$0xff] }
  0x38   : > { %297 = vst [vmem:[%s1664_s27 + $0x248] sm:$0xff] %v296_v9  ;;  %299 = vst [vmem:[%s1664_s27 + $0x250] sm:$0xff] %v298_v10  ;;  %v306_v14 = vld [vmem:[%s1656_s26 + $0x4d0] sm:$0xff]  ;;  %v308_v15 = vld [vmem:[%s1656_s26 + $0x4d8] sm:$0xff] }
  0x39   : > { %301 = vst [vmem:[%s1664_s27 + $0x258] sm:$0xff] %v300_v11  ;;  %303 = vst [vmem:[%s1664_s27 + $0x260] sm:$0xff] %v302_v12  ;;  %v310_v16 = vld [vmem:[%s1656_s26 + $0x500] sm:$0xff]  ;;  %v312_v17 = vld [vmem:[%s1656_s26 + $0x508] sm:$0xff] }
  0x3a   : > { %305 = vst [vmem:[%s1664_s27 + $0x268] sm:$0xff] %v304_v13  ;;  %307 = vst [vmem:[%s1664_s27 + $0x270] sm:$0xff] %v306_v14  ;;  %v314_v18 = vld [vmem:[%s1656_s26 + $0x510] sm:$0xff]  ;;  %v316_v19 = vld [vmem:[%s1656_s26 + $0x518] sm:$0xff] }
  0x3b   : > { %309 = vst [vmem:[%s1664_s27 + $0x278] sm:$0xff] %v308_v15  ;;  %311 = vst [vmem:[%s1664_s27 + $0x280] sm:$0xff] %v310_v16  ;;  %v318_v20 = vld [vmem:[%s1656_s26 + $0x540] sm:$0xff]  ;;  %v320_v21 = vld [vmem:[%s1656_s26 + $0x548] sm:$0xff] }
  0x3c   : > { %313 = vst [vmem:[%s1664_s27 + $0x288] sm:$0xff] %v312_v17  ;;  %315 = vst [vmem:[%s1664_s27 + $0x290] sm:$0xff] %v314_v18  ;;  %v322_v22 = vld [vmem:[%s1656_s26 + $0x550] sm:$0xff]  ;;  %v324_v23 = vld [vmem:[%s1656_s26 + $0x558] sm:$0xff] }
  0x3d   : > { %317 = vst [vmem:[%s1664_s27 + $0x298] sm:$0xff] %v316_v19  ;;  %319 = vst [vmem:[%s1664_s27 + $0x2a0] sm:$0xff] %v318_v20  ;;  %v326_v24 = vld [vmem:[%s1656_s26 + $0x580] sm:$0xff]  ;;  %v328_v25 = vld [vmem:[%s1656_s26 + $0x588] sm:$0xff] }
  0x3e   : > { %321 = vst [vmem:[%s1664_s27 + $0x2a8] sm:$0xff] %v320_v21  ;;  %323 = vst [vmem:[%s1664_s27 + $0x2b0] sm:$0xff] %v322_v22  ;;  %v330_v26 = vld [vmem:[%s1656_s26 + $0x590] sm:$0xff]  ;;  %v332_v27 = vld [vmem:[%s1656_s26 + $0x598] sm:$0xff] }
  0x3f   : > { %325 = vst [vmem:[%s1664_s27 + $0x2b8] sm:$0xff] %v324_v23  ;;  %327 = vst [vmem:[%s1664_s27 + $0x2c0] sm:$0xff] %v326_v24  ;;  %v334_v28 = vld [vmem:[%s1656_s26 + $0x5c0] sm:$0xff]  ;;  %v336_v29 = vld [vmem:[%s1656_s26 + $0x5c8] sm:$0xff] }
  0x40   : > { %329 = vst [vmem:[%s1664_s27 + $0x2c8] sm:$0xff] %v328_v25  ;;  %331 = vst [vmem:[%s1664_s27 + $0x2d0] sm:$0xff] %v330_v26  ;;  %v338_v30 = vld [vmem:[%s1656_s26 + $0x5d0] sm:$0xff]  ;;  %v340_v31 = vld [vmem:[%s1656_s26 + $0x5d8] sm:$0xff] }
  0x41   : > { %333 = vst [vmem:[%s1664_s27 + $0x2d8] sm:$0xff] %v332_v27  ;;  %335 = vst [vmem:[%s1664_s27 + $0x2e0] sm:$0xff] %v334_v28  ;;  %v342_v32 = vld [vmem:[%s1656_s26 + $0x600] sm:$0xff]  ;;  %v344_v33 = vld [vmem:[%s1656_s26 + $0x608] sm:$0xff] }
  0x42   : > { %337 = vst [vmem:[%s1664_s27 + $0x2e8] sm:$0xff] %v336_v29  ;;  %339 = vst [vmem:[%s1664_s27 + $0x2f0] sm:$0xff] %v338_v30  ;;  %v346_v34 = vld [vmem:[%s1656_s26 + $0x610] sm:$0xff]  ;;  %v348_v35 = vld [vmem:[%s1656_s26 + $0x618] sm:$0xff] }
  0x43   : > { %341 = vst [vmem:[%s1664_s27 + $0x2f8] sm:$0xff] %v340_v31  ;;  %343 = vst [vmem:[%s1664_s27 + $0x300] sm:$0xff] %v342_v32  ;;  %v350_v36 = vld [vmem:[%s1656_s26 + $0x640] sm:$0xff]  ;;  %v352_v37 = vld [vmem:[%s1656_s26 + $0x648] sm:$0xff] }
  0x44   : > { %345 = vst [vmem:[%s1664_s27 + $0x308] sm:$0xff] %v344_v33  ;;  %347 = vst [vmem:[%s1664_s27 + $0x310] sm:$0xff] %v346_v34  ;;  %v354_v38 = vld [vmem:[%s1656_s26 + $0x650] sm:$0xff]  ;;  %v356_v39 = vld [vmem:[%s1656_s26 + $0x658] sm:$0xff] }
  0x45   : > { %349 = vst [vmem:[%s1664_s27 + $0x318] sm:$0xff] %v348_v35  ;;  %351 = vst [vmem:[%s1664_s27 + $0x320] sm:$0xff] %v350_v36  ;;  %v358_v40 = vld [vmem:[%s1656_s26 + $0x680] sm:$0xff]  ;;  %v360_v41 = vld [vmem:[%s1656_s26 + $0x688] sm:$0xff] }
  0x46   : > { %353 = vst [vmem:[%s1664_s27 + $0x328] sm:$0xff] %v352_v37  ;;  %355 = vst [vmem:[%s1664_s27 + $0x330] sm:$0xff] %v354_v38  ;;  %v362_v42 = vld [vmem:[%s1656_s26 + $0x690] sm:$0xff]  ;;  %v364_v43 = vld [vmem:[%s1656_s26 + $0x698] sm:$0xff] }
  0x47   : > { %357 = vst [vmem:[%s1664_s27 + $0x338] sm:$0xff] %v356_v39  ;;  %359 = vst [vmem:[%s1664_s27 + $0x340] sm:$0xff] %v358_v40  ;;  %v366_v44 = vld [vmem:[%s1656_s26 + $0x6c0] sm:$0xff]  ;;  %v368_v45 = vld [vmem:[%s1656_s26 + $0x6c8] sm:$0xff] }
  0x48   : > { %361 = vst [vmem:[%s1664_s27 + $0x348] sm:$0xff] %v360_v41  ;;  %363 = vst [vmem:[%s1664_s27 + $0x350] sm:$0xff] %v362_v42  ;;  %v370_v46 = vld [vmem:[%s1656_s26 + $0x6d0] sm:$0xff]  ;;  %v372_v47 = vld [vmem:[%s1656_s26 + $0x6d8] sm:$0xff] }
  0x49   : > { %365 = vst [vmem:[%s1664_s27 + $0x358] sm:$0xff] %v364_v43  ;;  %367 = vst [vmem:[%s1664_s27 + $0x360] sm:$0xff] %v366_v44  ;;  %v374_v48 = vld [vmem:[%s1656_s26 + $0x700] sm:$0xff]  ;;  %v376_v49 = vld [vmem:[%s1656_s26 + $0x708] sm:$0xff] }
  0x4a   : > { %369 = vst [vmem:[%s1664_s27 + $0x368] sm:$0xff] %v368_v45  ;;  %371 = vst [vmem:[%s1664_s27 + $0x370] sm:$0xff] %v370_v46  ;;  %v378_v50 = vld [vmem:[%s1656_s26 + $0x710] sm:$0xff]  ;;  %v380_v51 = vld [vmem:[%s1656_s26 + $0x718] sm:$0xff] }
  0x4b   : > { %373 = vst [vmem:[%s1664_s27 + $0x378] sm:$0xff] %v372_v47  ;;  %375 = vst [vmem:[%s1664_s27 + $0x380] sm:$0xff] %v374_v48  ;;  %v382_v52 = vld [vmem:[%s1656_s26 + $0x740] sm:$0xff]  ;;  %v384_v53 = vld [vmem:[%s1656_s26 + $0x748] sm:$0xff] }
  0x4c   : > { %377 = vst [vmem:[%s1664_s27 + $0x388] sm:$0xff] %v376_v49  ;;  %379 = vst [vmem:[%s1664_s27 + $0x390] sm:$0xff] %v378_v50  ;;  %v386_v54 = vld [vmem:[%s1656_s26 + $0x750] sm:$0xff]  ;;  %v388_v55 = vld [vmem:[%s1656_s26 + $0x758] sm:$0xff] }
  0x4d   : > { %381 = vst [vmem:[%s1664_s27 + $0x398] sm:$0xff] %v380_v51  ;;  %383 = vst [vmem:[%s1664_s27 + $0x3a0] sm:$0xff] %v382_v52  ;;  %v390_v56 = vld [vmem:[%s1656_s26 + $0x780] sm:$0xff]  ;;  %v392_v57 = vld [vmem:[%s1656_s26 + $0x788] sm:$0xff] }
  0x4e   : > { %385 = vst [vmem:[%s1664_s27 + $0x3a8] sm:$0xff] %v384_v53  ;;  %387 = vst [vmem:[%s1664_s27 + $0x3b0] sm:$0xff] %v386_v54  ;;  %v394_v58 = vld [vmem:[%s1656_s26 + $0x790] sm:$0xff]  ;;  %v396_v59 = vld [vmem:[%s1656_s26 + $0x798] sm:$0xff] }
  0x4f   : > { %389 = vst [vmem:[%s1664_s27 + $0x3b8] sm:$0xff] %v388_v55  ;;  %391 = vst [vmem:[%s1664_s27 + $0x3c0] sm:$0xff] %v390_v56  ;;  %v398_v60 = vld [vmem:[%s1656_s26 + $0x7c0] sm:$0xff]  ;;  %v400_v61 = vld [vmem:[%s1656_s26 + $0x7c8] sm:$0xff] }
  0x50   : > { %393 = vst [vmem:[%s1664_s27 + $0x3c8] sm:$0xff] %v392_v57  ;;  %395 = vst [vmem:[%s1664_s27 + $0x3d0] sm:$0xff] %v394_v58  ;;  %v402_v62 = vld [vmem:[%s1656_s26 + $0x7d0] sm:$0xff]  ;;  %v404_v63 = vld [vmem:[%s1656_s26 + $0x7d8] sm:$0xff] }
  0x51   : > { %397 = vst [vmem:[%s1664_s27 + $0x3d8] sm:$0xff] %v396_v59  ;;  %399 = vst [vmem:[%s1664_s27 + $0x3e0] sm:$0xff] %v398_v60  ;;  %v406_v0 = vld [vmem:[%s1656_s26 + $0x800] sm:$0xff]  ;;  %v408_v1 = vld [vmem:[%s1656_s26 + $0x808] sm:$0xff] }
  0x52   : > { %401 = vst [vmem:[%s1664_s27 + $0x3e8] sm:$0xff] %v400_v61  ;;  %403 = vst [vmem:[%s1664_s27 + $0x3f0] sm:$0xff] %v402_v62  ;;  %v410_v2 = vld [vmem:[%s1656_s26 + $0x810] sm:$0xff]  ;;  %v412_v3 = vld [vmem:[%s1656_s26 + $0x818] sm:$0xff] }
  0x53   : > { %405 = vst [vmem:[%s1664_s27 + $0x3f8] sm:$0xff] %v404_v63  ;;  %407 = vst [vmem:[%s1664_s27 + $0x400] sm:$0xff] %v406_v0  ;;  %v414_v4 = vld [vmem:[%s1656_s26 + $0x840] sm:$0xff]  ;;  %v416_v5 = vld [vmem:[%s1656_s26 + $0x848] sm:$0xff] }
  0x54   : > { %409 = vst [vmem:[%s1664_s27 + $0x408] sm:$0xff] %v408_v1  ;;  %411 = vst [vmem:[%s1664_s27 + $0x410] sm:$0xff] %v410_v2  ;;  %v418_v6 = vld [vmem:[%s1656_s26 + $0x850] sm:$0xff]  ;;  %v420_v7 = vld [vmem:[%s1656_s26 + $0x858] sm:$0xff] }
  0x55   : > { %413 = vst [vmem:[%s1664_s27 + $0x418] sm:$0xff] %v412_v3  ;;  %415 = vst [vmem:[%s1664_s27 + $0x420] sm:$0xff] %v414_v4  ;;  %v422_v8 = vld [vmem:[%s1656_s26 + $0x880] sm:$0xff]  ;;  %v424_v9 = vld [vmem:[%s1656_s26 + $0x888] sm:$0xff] }
  0x56   : > { %417 = vst [vmem:[%s1664_s27 + $0x428] sm:$0xff] %v416_v5  ;;  %419 = vst [vmem:[%s1664_s27 + $0x430] sm:$0xff] %v418_v6  ;;  %v426_v10 = vld [vmem:[%s1656_s26 + $0x890] sm:$0xff]  ;;  %v428_v11 = vld [vmem:[%s1656_s26 + $0x898] sm:$0xff] }
  0x57   : > { %421 = vst [vmem:[%s1664_s27 + $0x438] sm:$0xff] %v420_v7  ;;  %423 = vst [vmem:[%s1664_s27 + $0x440] sm:$0xff] %v422_v8  ;;  %v430_v12 = vld [vmem:[%s1656_s26 + $0x8c0] sm:$0xff]  ;;  %v432_v13 = vld [vmem:[%s1656_s26 + $0x8c8] sm:$0xff] }
  0x58   : > { %425 = vst [vmem:[%s1664_s27 + $0x448] sm:$0xff] %v424_v9  ;;  %427 = vst [vmem:[%s1664_s27 + $0x450] sm:$0xff] %v426_v10  ;;  %v434_v14 = vld [vmem:[%s1656_s26 + $0x8d0] sm:$0xff]  ;;  %v436_v15 = vld [vmem:[%s1656_s26 + $0x8d8] sm:$0xff] }
  0x59   : > { %429 = vst [vmem:[%s1664_s27 + $0x458] sm:$0xff] %v428_v11  ;;  %431 = vst [vmem:[%s1664_s27 + $0x460] sm:$0xff] %v430_v12 }
  0x5a   : > { %433 = vst [vmem:[%s1664_s27 + $0x468] sm:$0xff] %v432_v13  ;;  %435 = vst [vmem:[%s1664_s27 + $0x470] sm:$0xff] %v434_v14 }
  0x5b   : > { %437 = vst [vmem:[%s1664_s27 + $0x478] sm:$0xff] %v436_v15 }
  0x5c PF: > { %p1408_p7 = scmp.ge.s32.totalorder %s1592_s14, 1  ;;  %p442_p8 = scmp.lt.s32.totalorder %s1592_s14, 3 }
  0x5e   : > { %p443_p9 = pnand %p1408_p7, %p442_p8 }
  0x5f   : > { %s449_s28 = sand.u32 (!%p443_p9), 1, %s1584_s12  }
  0x60   : > { %446 = sbr.rel (%p443_p9) target bundleno = 402 (0x192), region = 51  ;;  %s1409_s17 = sshll.u32 (!%p443_p9), %s449_s28, 6 }
  0x61   : > { %s1542_s29 = smul.u32 (!%p443_p9), 1152, %s449_s28  ;;  %s2165_s12 = scalar_lea.vmem (!%p443_p9), [#allocation3], %s1409_s17 }
  0x63   : > { %s1958_s5 = scalar_lea.vmem (!%p443_p9), [#allocation2], %s1542_s29 }
  0x65   : > { %v1594_v16 = vmov 0.0   ;;  %v1269_v17 = vld [vmem:[%s2202_s2] sm:$0xff]  ;;  %v1595_v18 = vmov 0   ;;  %v508_v19 = vld [vmem:[%s1958_s5 + $0x108] sm:$0xff]  ;;  %v510_v20 = vld [vmem:[%s1958_s5 + $0x118] sm:$0xff]  ;;  %vm511_vm0 = vcmask 588800  }
  0x66   : > { %582 = vmatprep.mubr.f32.mxu0 %v1594_v16  ;;  %659 = vmatprep.mubr.f32.mxu1 %v1594_v16  ;;  %v507_v21 = vld [vmem:[%s1958_s5 + $0x100] sm:$0xff]  ;;  %v509_v22 = vld [vmem:[%s1958_s5 + $0x110] sm:$0xff]  ;;  %v504_v23 = vld [vmem:[%s1958_s5 + $0xe8] sm:$0xff]  ;;  %s1540_s18 = sshll.u32 (%p1646_p5), %s1402_s15, 5 }
  0x67   : > { %1569 = vset.pattern.permute.xlu0 %v1595_v18  ;;  %532 = vmatprep.subr.mxu0 %v508_v19  ;;  %v506_v24 = vld [vmem:[%s1958_s5 + $0xf8] sm:$0xff]  ;;  %v503_v25 = vld [vmem:[%s1958_s5 + $0xe0] sm:$0xff]  ;;  %v505_v26 = vld [vmem:[%s1958_s5 + $0xf0] sm:$0xff]  ;;  %s1314_s23 = scalar_lea.vmem (%p1646_p5), %s2203_s3, %s1540_s18 }
  0x68   : > { %1273 = vperm.xlu0 %1569, %v1269_v17   ;;  %609 = vmatprep.subr.mxu1 %v510_v20  ;;  %v500_v27 = vld [vmem:[%s1958_s5 + $0xc8] sm:$0xff]  ;;  %v502_v28 = vld [vmem:[%s1958_s5 + $0xd8] sm:$0xff]  ;;  %v499_v29 = vld [vmem:[%s1958_s5 + $0xc0] sm:$0xff] }
  0x69   : > { %533 = vmatpush1.msra.mxu0 %v507_v21  ;;  %610 = vmatpush1.msra.mxu1 %v509_v22  ;;  %v501_v30 = vld [vmem:[%s1958_s5 + $0xd0] sm:$0xff]  ;;  %v496_v31 = vld [vmem:[%s1958_s5 + $0xa8] sm:$0xff]  ;;  %v498_v32 = vld [vmem:[%s1958_s5 + $0xb8] sm:$0xff] }
  0x6a   : > { %534 = vmatprep.subr.mxu0 %v504_v23  ;;  %611 = vmatprep.subr.mxu1 %v506_v24  ;;  %v495_v33 = vld [vmem:[%s1958_s5 + $0xa0] sm:$0xff]  ;;  %v497_v34 = vld [vmem:[%s1958_s5 + $0xb0] sm:$0xff]  ;;  %v492_v35 = vld [vmem:[%s1958_s5 + $0x88] sm:$0xff] }
  0x6b   : > { %535 = vmatpush1.msra.mxu0 %v503_v25  ;;  %612 = vmatpush1.msra.mxu1 %v505_v26  ;;  %v494_v36 = vld [vmem:[%s1958_s5 + $0x98] sm:$0xff]  ;;  %v491_v37 = vld [vmem:[%s1958_s5 + $0x80] sm:$0xff]  ;;  %v493_v38 = vld [vmem:[%s1958_s5 + $0x90] sm:$0xff] }
  0x6c   : > { %536 = vmatprep.subr.mxu0 %v500_v27  ;;  %613 = vmatprep.subr.mxu1 %v502_v28  ;;  %v488_v39 = vld [vmem:[%s1958_s5 + $0x68] sm:$0xff]  ;;  %v490_v40 = vld [vmem:[%s1958_s5 + $0x78] sm:$0xff]  ;;  %v487_v41 = vld [vmem:[%s1958_s5 + $0x60] sm:$0xff] }
  0x6d   : > { %537 = vmatpush1.msra.mxu0 %v499_v29  ;;  %614 = vmatpush1.msra.mxu1 %v501_v30  ;;  %v489_v42 = vld [vmem:[%s1958_s5 + $0x70] sm:$0xff]  ;;  %v484_v43 = vld [vmem:[%s1958_s5 + $0x48] sm:$0xff]  ;;  %v486_v44 = vld [vmem:[%s1958_s5 + $0x58] sm:$0xff] }
  0x6e   : > { %538 = vmatprep.subr.mxu0 %v496_v31  ;;  %615 = vmatprep.subr.mxu1 %v498_v32  ;;  %v483_v45 = vld [vmem:[%s1958_s5 + $0x40] sm:$0xff]  ;;  %v485_v46 = vld [vmem:[%s1958_s5 + $0x50] sm:$0xff]  ;;  %v480_v47 = vld [vmem:[%s1958_s5 + $0x28] sm:$0xff] }
  0x6f   : > { %539 = vmatpush1.msra.mxu0 %v495_v33  ;;  %616 = vmatpush1.msra.mxu1 %v497_v34  ;;  %v482_v48 = vld [vmem:[%s1958_s5 + $0x38] sm:$0xff]  ;;  %v479_v49 = vld [vmem:[%s1958_s5 + $0x20] sm:$0xff]  ;;  %v481_v50 = vld [vmem:[%s1958_s5 + $0x30] sm:$0xff] }
  0x70   : > { %540 = vmatprep.subr.mxu0 %v492_v35  ;;  %617 = vmatprep.subr.mxu1 %v494_v36  ;;  %v476_v51 = vld [vmem:[%s1958_s5 + $0x8] sm:$0xff]  ;;  %v478_v52 = vld [vmem:[%s1958_s5 + $0x18] sm:$0xff]  ;;  %v475_v53 = vld [vmem:[%s1958_s5] sm:$0xff] }
  0x71   : > { %541 = vmatpush1.msra.mxu0 %v491_v37  ;;  %618 = vmatpush1.msra.mxu1 %v493_v38  ;;  %v477_v54 = vld [vmem:[%s1958_s5 + $0x10] sm:$0xff]  ;;  %v1999_v55 = vld [vmem:[%s2201_s1] sm:$0xff]  ;;  %v1447_v56 = vld [vmem:[%s1958_s5 + $0x228] sm:$0xff] }
  0x72   : > { %542 = vmatprep.subr.mxu0 %v488_v39  ;;  %619 = vmatprep.subr.mxu1 %v490_v40  ;;  %v1449_v57 = vld [vmem:[%s1958_s5 + $0x238] sm:$0xff]  ;;  %v1446_v58 = vld [vmem:[%s1958_s5 + $0x220] sm:$0xff]  ;;  %v1448_v59 = vld [vmem:[%s1958_s5 + $0x230] sm:$0xff] }
  0x73   : > { %543 = vmatpush1.msra.mxu0 %v487_v41  ;;  %620 = vmatpush1.msra.mxu1 %v489_v42  ;;  %v1443_v60 = vld [vmem:[%s1958_s5 + $0x208] sm:$0xff]  ;;  %v1445_v61 = vld [vmem:[%s1958_s5 + $0x218] sm:$0xff]  ;;  %v1442_v62 = vld [vmem:[%s1958_s5 + $0x200] sm:$0xff] }
  0x74   : > { %544 = vmatprep.subr.mxu0 %v484_v43  ;;  %621 = vmatprep.subr.mxu1 %v486_v44  ;;  %v1444_v63 = vld [vmem:[%s1958_s5 + $0x210] sm:$0xff]  ;;  %v1439_v0 = vld [vmem:[%s1958_s5 + $0x1e8] sm:$0xff]  ;;  %v1441_v1 = vld [vmem:[%s1958_s5 + $0x1f8] sm:$0xff] }
  0x75   : > { %545 = vmatpush1.msra.mxu0 %v483_v45  ;;  %622 = vmatpush1.msra.mxu1 %v485_v46  ;;  %v1438_v2 = vld [vmem:[%s1958_s5 + $0x1e0] sm:$0xff]  ;;  %v1440_v3 = vld [vmem:[%s1958_s5 + $0x1f0] sm:$0xff]  ;;  %v1435_v4 = vld [vmem:[%s1958_s5 + $0x1c8] sm:$0xff] }
  0x76   : > { %546 = vmatprep.subr.mxu0 %v480_v47  ;;  %623 = vmatprep.subr.mxu1 %v482_v48  ;;  %v1437_v5 = vld [vmem:[%s1958_s5 + $0x1d8] sm:$0xff]  ;;  %v1434_v6 = vld [vmem:[%s1958_s5 + $0x1c0] sm:$0xff]  ;;  %v1436_v7 = vld [vmem:[%s1958_s5 + $0x1d0] sm:$0xff] }
  0x77   : > { %547 = vmatpush1.msra.mxu0 %v479_v49  ;;  %624 = vmatpush1.msra.mxu1 %v481_v50  ;;  %v1431_v8 = vld [vmem:[%s1958_s5 + $0x1a8] sm:$0xff]  ;;  %v1433_v9 = vld [vmem:[%s1958_s5 + $0x1b8] sm:$0xff]  ;;  %v1430_v10 = vld [vmem:[%s1958_s5 + $0x1a0] sm:$0xff] }
  0x78   : > { %548 = vmatprep.subr.mxu0 %v476_v51  ;;  %625 = vmatprep.subr.mxu1 %v478_v52  ;;  %v1432_v11 = vld [vmem:[%s1958_s5 + $0x1b0] sm:$0xff]  ;;  %v1427_v12 = vld [vmem:[%s1958_s5 + $0x188] sm:$0xff]  ;;  %v1429_v13 = vld [vmem:[%s1958_s5 + $0x198] sm:$0xff] }
  0x79   : > { %549 = vmatpush1.msra.mxu0 %v475_v53  ;;  %626 = vmatpush1.msra.mxu1 %v477_v54  ;;  %v1426_v14 = vld [vmem:[%s1958_s5 + $0x180] sm:$0xff]  ;;  %v1428_v15 = vld [vmem:[%s1958_s5 + $0x190] sm:$0xff]  ;;  %v1423_v17 = vld [vmem:[%s1958_s5 + $0x168] sm:$0xff] }
  0x7a   : > { %1410 = vmatmul.mubr.msk.f32.vlgmr.msra.gmra.mxu0 %vm511_vm0, %v1999_v55  ;;  %1412 = vmatmul.mubr.msk.f32.vlgmr.msra.gmra.mxu1 %vm511_vm0, %v1999_v55  ;;  %v1425_v18 = vld [vmem:[%s1958_s5 + $0x178] sm:$0xff]  ;;  %v2034_v19 = vld [vmem:[%s2201_s1 + $0x8] sm:$0xff]  ;;  %v1422_v20 = vld [vmem:[%s1958_s5 + $0x160] sm:$0xff] }
  0x7b   : > { %723 = vmatprep.subr.mxu0 %v1447_v56  ;;  %800 = vmatprep.subr.mxu1 %v1449_v57  ;;  %v1424_v21 = vld [vmem:[%s1958_s5 + $0x170] sm:$0xff]  ;;  %v1419_v22 = vld [vmem:[%s1958_s5 + $0x148] sm:$0xff]  ;;  %v1421_v23 = vld [vmem:[%s1958_s5 + $0x158] sm:$0xff] }
  0x7c   : > { %724 = vmatpush1.msra.mxu0 %v1446_v58  ;;  %801 = vmatpush1.msra.mxu1 %v1448_v59  ;;  %v1418_v24 = vld [vmem:[%s1958_s5 + $0x140] sm:$0xff]  ;;  %v1420_v25 = vld [vmem:[%s1958_s5 + $0x150] sm:$0xff]  ;;  %v1415_v26 = vld [vmem:[%s1958_s5 + $0x128] sm:$0xff] }
  0x7d   : > { %725 = vmatprep.subr.mxu0 %v1443_v60  ;;  %802 = vmatprep.subr.mxu1 %v1445_v61  ;;  %v1417_v27 = vld [vmem:[%s1958_s5 + $0x138] sm:$0xff]  ;;  %v1414_v28 = vld [vmem:[%s1958_s5 + $0x120] sm:$0xff]  ;;  %v1416_v29 = vld [vmem:[%s1958_s5 + $0x130] sm:$0xff] }
  0x7e   : > { %726 = vmatpush1.msra.mxu0 %v1442_v62  ;;  %803 = vmatpush1.msra.mxu1 %v1444_v63  ;;  %v1487_v30 = vld [vmem:[%s1958_s5 + $0x348] sm:$0xff]  ;;  %v1489_v31 = vld [vmem:[%s1958_s5 + $0x358] sm:$0xff]  ;;  %v1486_v32 = vld [vmem:[%s1958_s5 + $0x340] sm:$0xff] }
  0x7f   : > { %727 = vmatprep.subr.mxu0 %v1439_v0  ;;  %804 = vmatprep.subr.mxu1 %v1441_v1  ;;  %v1488_v33 = vld [vmem:[%s1958_s5 + $0x350] sm:$0xff]  ;;  %v1483_v34 = vld [vmem:[%s1958_s5 + $0x328] sm:$0xff]  ;;  %v1485_v35 = vld [vmem:[%s1958_s5 + $0x338] sm:$0xff] }
  0x80   : > { %728 = vmatpush1.msra.mxu0 %v1438_v2  ;;  %805 = vmatpush1.msra.mxu1 %v1440_v3  ;;  %v1482_v36 = vld [vmem:[%s1958_s5 + $0x320] sm:$0xff]  ;;  %v1484_v37 = vld [vmem:[%s1958_s5 + $0x330] sm:$0xff]  ;;  %v1479_v38 = vld [vmem:[%s1958_s5 + $0x308] sm:$0xff] }
  0x81   : > { %729 = vmatprep.subr.mxu0 %v1435_v4  ;;  %806 = vmatprep.subr.mxu1 %v1437_v5  ;;  %v1481_v39 = vld [vmem:[%s1958_s5 + $0x318] sm:$0xff]  ;;  %v1478_v40 = vld [vmem:[%s1958_s5 + $0x300] sm:$0xff]  ;;  %v1480_v41 = vld [vmem:[%s1958_s5 + $0x310] sm:$0xff] }
  0x82   : > { %730 = vmatpush1.msra.mxu0 %v1434_v6  ;;  %807 = vmatpush1.msra.mxu1 %v1436_v7  ;;  %v1475_v42 = vld [vmem:[%s1958_s5 + $0x2e8] sm:$0xff]  ;;  %v1477_v43 = vld [vmem:[%s1958_s5 + $0x2f8] sm:$0xff]  ;;  %v1474_v44 = vld [vmem:[%s1958_s5 + $0x2e0] sm:$0xff] }
  0x83   : > { %731 = vmatprep.subr.mxu0 %v1431_v8  ;;  %808 = vmatprep.subr.mxu1 %v1433_v9  ;;  %v1476_v45 = vld [vmem:[%s1958_s5 + $0x2f0] sm:$0xff]  ;;  %v1471_v46 = vld [vmem:[%s1958_s5 + $0x2c8] sm:$0xff]  ;;  %v1473_v47 = vld [vmem:[%s1958_s5 + $0x2d8] sm:$0xff] }
  0x84   : > { %732 = vmatpush1.msra.mxu0 %v1430_v10  ;;  %809 = vmatpush1.msra.mxu1 %v1432_v11  ;;  %v1470_v48 = vld [vmem:[%s1958_s5 + $0x2c0] sm:$0xff]  ;;  %v1472_v49 = vld [vmem:[%s1958_s5 + $0x2d0] sm:$0xff]  ;;  %v1467_v50 = vld [vmem:[%s1958_s5 + $0x2a8] sm:$0xff] }
  0x85   : > { %733 = vmatprep.subr.mxu0 %v1427_v12  ;;  %810 = vmatprep.subr.mxu1 %v1429_v13  ;;  %v1469_v51 = vld [vmem:[%s1958_s5 + $0x2b8] sm:$0xff]  ;;  %v1466_v52 = vld [vmem:[%s1958_s5 + $0x2a0] sm:$0xff]  ;;  %v1468_v53 = vld [vmem:[%s1958_s5 + $0x2b0] sm:$0xff] }
  0x86   : > { %734 = vmatpush1.msra.mxu0 %v1426_v14  ;;  %811 = vmatpush1.msra.mxu1 %v1428_v15  ;;  %v1463_v54 = vld [vmem:[%s1958_s5 + $0x288] sm:$0xff]  ;;  %v1465_v56 = vld [vmem:[%s1958_s5 + $0x298] sm:$0xff]  ;;  %v1462_v57 = vld [vmem:[%s1958_s5 + $0x280] sm:$0xff] }
  0x87   : > { %588 = vmatprep.mubr.f32.mxu0 %v1594_v16  ;;  %665 = vmatprep.mubr.f32.mxu1 %v1594_v16  ;;  %v1464_v58 = vld [vmem:[%s1958_s5 + $0x290] sm:$0xff]  ;;  %v1459_v59 = vld [vmem:[%s1958_s5 + $0x268] sm:$0xff]  ;;  %v1461_v60 = vld [vmem:[%s1958_s5 + $0x278] sm:$0xff] }
  0x88   : > { %735 = vmatprep.subr.mxu0 %v1423_v17  ;;  %812 = vmatprep.subr.mxu1 %v1425_v18  ;;  %v1458_v61 = vld [vmem:[%s1958_s5 + $0x260] sm:$0xff]  ;;  %v1460_v62 = vld [vmem:[%s1958_s5 + $0x270] sm:$0xff]  ;;  %v1455_v63 = vld [vmem:[%s1958_s5 + $0x248] sm:$0xff] }
  0x89   : > { %1411 = vmatmul.mubr.msk.f32.gmra.mxu0 %vm511_vm0, %v2034_v19  ;;  %1413 = vmatmul.mubr.msk.f32.gmra.mxu1 %vm511_vm0, %v2034_v19  ;;  %v1457_v0 = vld [vmem:[%s1958_s5 + $0x258] sm:$0xff]  ;;  %v1454_v1 = vld [vmem:[%s1958_s5 + $0x240] sm:$0xff]  ;;  %v1456_v2 = vld [vmem:[%s1958_s5 + $0x250] sm:$0xff] }
  0x8a   : > { %736 = vmatpush1.msra.mxu0 %v1422_v20  ;;  %813 = vmatpush1.msra.mxu1 %v1424_v21  ;;  %v1527_v3 = vld [vmem:[%s1958_s5 + $0x468] sm:$0xff]  ;;  %v1529_v4 = vld [vmem:[%s1958_s5 + $0x478] sm:$0xff]  ;;  %v1526_v5 = vld [vmem:[%s1958_s5 + $0x460] sm:$0xff] }
  0x8b   : > { %737 = vmatprep.subr.mxu0 %v1419_v22  ;;  %814 = vmatprep.subr.mxu1 %v1421_v23  ;;  %v1528_v6 = vld [vmem:[%s1958_s5 + $0x470] sm:$0xff]  ;;  %v1523_v7 = vld [vmem:[%s1958_s5 + $0x448] sm:$0xff]  ;;  %v1525_v8 = vld [vmem:[%s1958_s5 + $0x458] sm:$0xff] }
  0x8c   : > { %738 = vmatpush1.msra.mxu0 %v1418_v24  ;;  %815 = vmatpush1.msra.mxu1 %v1420_v25  ;;  %v1522_v9 = vld [vmem:[%s1958_s5 + $0x440] sm:$0xff]  ;;  %v1524_v10 = vld [vmem:[%s1958_s5 + $0x450] sm:$0xff]  ;;  %v1519_v11 = vld [vmem:[%s1958_s5 + $0x428] sm:$0xff] }
  0x8d   : > { %739 = vmatprep.subr.mxu0 %v1415_v26  ;;  %816 = vmatprep.subr.mxu1 %v1417_v27  ;;  %v1521_v12 = vld [vmem:[%s1958_s5 + $0x438] sm:$0xff]  ;;  %v1518_v13 = vld [vmem:[%s1958_s5 + $0x420] sm:$0xff]  ;;  %v1520_v14 = vld [vmem:[%s1958_s5 + $0x430] sm:$0xff] }
  0x8e   : > { %740 = vmatpush1.msra.mxu0 %v1414_v28  ;;  %773 = vmatprep.mubr.f32.mxu0 %v1594_v16  ;;  %v1515_v15 = vld [vmem:[%s1958_s5 + $0x408] sm:$0xff]  ;;  %v1517_v17 = vld [vmem:[%s1958_s5 + $0x418] sm:$0xff]  ;;  %v1514_v18 = vld [vmem:[%s1958_s5 + $0x400] sm:$0xff] }
  0x8f   : > { %817 = vmatpush1.msra.mxu1 %v1416_v29  ;;  %850 = vmatprep.mubr.f32.mxu1 %v1594_v16  ;;  %v1516_v20 = vld [vmem:[%s1958_s5 + $0x410] sm:$0xff]  ;;  %v1511_v21 = vld [vmem:[%s1958_s5 + $0x3e8] sm:$0xff]  ;;  %v1513_v22 = vld [vmem:[%s1958_s5 + $0x3f8] sm:$0xff] }
  0x90   : > { %1450 = vmatmul.mubr.msk.f32.vlgmr.msra.gmra.mxu0 %vm511_vm0, %v1999_v55  ;;  %1452 = vmatmul.mubr.msk.f32.vlgmr.msra.gmra.mxu1 %vm511_vm0, %v1999_v55  ;;  %v1510_v23 = vld [vmem:[%s1958_s5 + $0x3e0] sm:$0xff]  ;;  %v1512_v24 = vld [vmem:[%s1958_s5 + $0x3f0] sm:$0xff]  ;;  %v1507_v25 = vld [vmem:[%s1958_s5 + $0x3c8] sm:$0xff] }
  0x91   : > { %922 = vmatprep.subr.mxu0 %v1487_v30  ;;  %999 = vmatprep.subr.mxu1 %v1489_v31  ;;  %v1509_v26 = vld [vmem:[%s1958_s5 + $0x3d8] sm:$0xff]  ;;  %v1506_v27 = vld [vmem:[%s1958_s5 + $0x3c0] sm:$0xff]  ;;  %v1508_v28 = vld [vmem:[%s1958_s5 + $0x3d0] sm:$0xff] }
  0x92   : > { %923 = vmatpush1.msra.mxu0 %v1486_v32  ;;  %1000 = vmatpush1.msra.mxu1 %v1488_v33  ;;  %v1503_v29 = vld [vmem:[%s1958_s5 + $0x3a8] sm:$0xff]  ;;  %v1505_v30 = vld [vmem:[%s1958_s5 + $0x3b8] sm:$0xff]  ;;  %v1502_v31 = vld [vmem:[%s1958_s5 + $0x3a0] sm:$0xff] }
  0x93   : > { %924 = vmatprep.subr.mxu0 %v1483_v34  ;;  %1001 = vmatprep.subr.mxu1 %v1485_v35  ;;  %v1504_v32 = vld [vmem:[%s1958_s5 + $0x3b0] sm:$0xff]  ;;  %v1499_v33 = vld [vmem:[%s1958_s5 + $0x388] sm:$0xff]  ;;  %v1501_v34 = vld [vmem:[%s1958_s5 + $0x398] sm:$0xff] }
  0x94   : > { %779 = vmatprep.mubr.f32.mxu0 %v1594_v16  ;;  %856 = vmatprep.mubr.f32.mxu1 %v1594_v16  ;;  %v1498_v35 = vld [vmem:[%s1958_s5 + $0x380] sm:$0xff] }
  0x95   : > { %925 = vmatpush1.msra.mxu0 %v1482_v36  ;;  %1002 = vmatpush1.msra.mxu1 %v1484_v37  ;;  %v1500_v36 = vld [vmem:[%s1958_s5 + $0x390] sm:$0xff]  ;;  %v1495_v37 = vld [vmem:[%s1958_s5 + $0x368] sm:$0xff] }
  0x96   : > { %1451 = vmatmul.mubr.msk.f32.gmra.mxu0 %vm511_vm0, %v2034_v19  ;;  %1453 = vmatmul.mubr.msk.f32.gmra.mxu1 %vm511_vm0, %v2034_v19 }
  0x97   : > { %926 = vmatprep.subr.mxu0 %v1479_v38  ;;  %1003 = vmatprep.subr.mxu1 %v1481_v39  ;;  %v1497_v38 = vld [vmem:[%s1958_s5 + $0x378] sm:$0xff]  ;;  %v1494_v39 = vld [vmem:[%s1958_s5 + $0x360] sm:$0xff] }
  0x98   : > { %927 = vmatpush1.msra.mxu0 %v1478_v40  ;;  %1004 = vmatpush1.msra.mxu1 %v1480_v41  ;;  %v1496_v40 = vld [vmem:[%s1958_s5 + $0x370] sm:$0xff]  ;;  %v1270_v41 = vld [vmem:[%s2202_s2 + $0x8] sm:$0xff] }
  0x99   : > { %928 = vmatprep.subr.mxu0 %v1475_v42  ;;  %1005 = vmatprep.subr.mxu1 %v1477_v43 }
  0x9a   : > { %929 = vmatpush1.msra.mxu0 %v1474_v44  ;;  %1006 = vmatpush1.msra.mxu1 %v1476_v45 }
  0x9b   : > { %930 = vmatprep.subr.mxu0 %v1471_v46  ;;  %1007 = vmatprep.subr.mxu1 %v1473_v47 }
  0x9c   : > { %931 = vmatpush1.msra.mxu0 %v1470_v48  ;;  %1008 = vmatpush1.msra.mxu1 %v1472_v49 }
  0x9d   : > { %932 = vmatprep.subr.mxu0 %v1467_v50  ;;  %1009 = vmatprep.subr.mxu1 %v1469_v51 }
  0x9e   : > { %933 = vmatpush1.msra.mxu0 %v1466_v52  ;;  %1010 = vmatpush1.msra.mxu1 %v1468_v53 }
  0x9f   : > { %934 = vmatprep.subr.mxu0 %v1463_v54  ;;  %1011 = vmatprep.subr.mxu1 %v1465_v56 }
  0xa0   : > { %935 = vmatpush1.msra.mxu0 %v1462_v57  ;;  %1012 = vmatpush1.msra.mxu1 %v1464_v58 }
  0xa1   : > { %936 = vmatprep.subr.mxu0 %v1459_v59  ;;  %1013 = vmatprep.subr.mxu1 %v1461_v60 }
  0xa2   : > { %937 = vmatpush1.msra.mxu0 %v1458_v61  ;;  %1014 = vmatpush1.msra.mxu1 %v1460_v62 }
  0xa3   : > { %938 = vmatprep.subr.mxu0 %v1455_v63  ;;  %1015 = vmatprep.subr.mxu1 %v1457_v0 }
  0xa4   : > { %939 = vmatpush1.msra.mxu0 %v1454_v1  ;;  %972 = vmatprep.mubr.f32.mxu0 %v1594_v16 }
  0xa5   : > { %1016 = vmatpush1.msra.mxu1 %v1456_v2  ;;  %1049 = vmatprep.mubr.f32.mxu1 %v1594_v16 }
  0xa6   : > { %1490 = vmatmul.mubr.msk.f32.vlgmr.msra.gmra.mxu0 %vm511_vm0, %v1999_v55  ;;  %1492 = vmatmul.mubr.msk.f32.vlgmr.msra.gmra.mxu1 %vm511_vm0, %v1999_v55 }
  0xa7   : > { %1121 = vmatprep.subr.mxu0 %v1527_v3  ;;  %1198 = vmatprep.subr.mxu1 %v1529_v4 }
  0xa8   : > { %1122 = vmatpush1.msra.mxu0 %v1526_v5  ;;  %1199 = vmatpush1.msra.mxu1 %v1528_v6 }
  0xa9   : > { %1123 = vmatprep.subr.mxu0 %v1523_v7  ;;  %1200 = vmatprep.subr.mxu1 %v1525_v8 }
  0xaa   : > { %978 = vmatprep.mubr.f32.mxu0 %v1594_v16  ;;  %1055 = vmatprep.mubr.f32.mxu1 %v1594_v16 }
  0xab   : > { %1124 = vmatpush1.msra.mxu0 %v1522_v9  ;;  %1201 = vmatpush1.msra.mxu1 %v1524_v10 }
  0xac   : > { %1491 = vmatmul.mubr.msk.f32.gmra.mxu0 %vm511_vm0, %v2034_v19  ;;  %1493 = vmatmul.mubr.msk.f32.gmra.mxu1 %vm511_vm0, %v2034_v19 }
  0xad   : > { %1125 = vmatprep.subr.mxu0 %v1519_v11  ;;  %1202 = vmatprep.subr.mxu1 %v1521_v12 }
  0xae   : > { %1126 = vmatpush1.msra.mxu0 %v1518_v13  ;;  %1203 = vmatpush1.msra.mxu1 %v1520_v14 }
  0xaf   : > { %1127 = vmatprep.subr.mxu0 %v1515_v15  ;;  %1204 = vmatprep.subr.mxu1 %v1517_v17 }
  0xb0   : > { %1128 = vmatpush1.msra.mxu0 %v1514_v18  ;;  %1205 = vmatpush1.msra.mxu1 %v1516_v20 }
  0xb1   : > { %1129 = vmatprep.subr.mxu0 %v1511_v21  ;;  %1206 = vmatprep.subr.mxu1 %v1513_v22 }
  0xb2   : > { %1130 = vmatpush1.msra.mxu0 %v1510_v23  ;;  %1207 = vmatpush1.msra.mxu1 %v1512_v24 }
  0xb3   : > { %1131 = vmatprep.subr.mxu0 %v1507_v25  ;;  %1208 = vmatprep.subr.mxu1 %v1509_v26 }
  0xb4   : > { %1132 = vmatpush1.msra.mxu0 %v1506_v27  ;;  %1209 = vmatpush1.msra.mxu1 %v1508_v28 }
  0xb5   : > { %1133 = vmatprep.subr.mxu0 %v1503_v29  ;;  %1210 = vmatprep.subr.mxu1 %v1505_v30 }
  0xb6   : > { %1134 = vmatpush1.msra.mxu0 %v1502_v31  ;;  %1211 = vmatpush1.msra.mxu1 %v1504_v32 }
  0xb7   : > { %1135 = vmatprep.subr.mxu0 %v1499_v33  ;;  %1212 = vmatprep.subr.mxu1 %v1501_v34 }
  0xb8   : > { %1136 = vmatpush1.msra.mxu0 %v1498_v35  ;;  %1213 = vmatpush1.msra.mxu1 %v1500_v36 }
  0xb9   : > { %1137 = vmatprep.subr.mxu0 %v1495_v37  ;;  %1214 = vmatprep.subr.mxu1 %v1497_v38 }
  0xba   : > { %1138 = vmatpush1.msra.mxu0 %v1494_v39  ;;  %1171 = vmatprep.mubr.f32.mxu0 %v1594_v16 }
  0xbb   : > { %1215 = vmatpush1.msra.mxu1 %v1496_v40  ;;  %1248 = vmatprep.mubr.f32.mxu1 %v1594_v16 }
  0xbc   : > { %1530 = vmatmul.mubr.msk.f32.vlgmr.msra.gmra.mxu0 %vm511_vm0, %v1999_v55  ;;  %1532 = vmatmul.mubr.msk.f32.vlgmr.msra.gmra.mxu1 %vm511_vm0, %v1999_v55 }
  0xbd   : > { %1177 = vmatprep.mubr.f32.mxu0 %v1594_v16  ;;  %1254 = vmatprep.mubr.f32.mxu1 %v1594_v16 }
  0xbe   : > { %1278 = vperm.xlu0 %1569, %v1270_v41  }
  0xc0   : > { %1531 = vmatmul.mubr.msk.f32.gmra.mxu0 %vm511_vm0, %v2034_v19  ;;  %1533 = vmatmul.mubr.msk.f32.gmra.mxu1 %vm511_vm0, %v2034_v19 }
  0xe3   : > { %v1274_v10 = vpop.permute.xlu0 %1273 }
 0x139   : > { %v1279_v41 = vpop.permute.xlu0 %1278 }
 0x13a   : > { %v584_v42 = vpop.f32.mrf.mxu0  ;;  %v661_v43 = vpop.f32.mrf.mxu1 }
 0x13c   : > { %v586_v44 = vpop.f32.mrf.mxu0  ;;  %v663_v45 = vpop.f32.mrf.mxu1 }
 0x149   : > { %v590_v46 = vpop.f32.mrf.mxu0  ;;  %v667_v47 = vpop.f32.mrf.mxu1 }
 0x14b   : > { %v592_v48 = vpop.f32.mrf.mxu0  ;;  %v669_v49 = vpop.f32.mrf.mxu1 }
 0x150   : > { %v775_v55 = vpop.f32.mrf.mxu0  ;;  %v852_v50 = vpop.f32.mrf.mxu1 }
 0x151   : > { %v863_v62 = vmax.f32 %v584_v42, %v775_v55  ;;  %v865_v63 = vmax.f32 %v661_v43, %v852_v50 }
 0x152   : > { %v777_v51 = vpop.f32.mrf.mxu0  ;;  %v854_v52 = vpop.f32.mrf.mxu1 }
 0x153   : > { %v864_v2 = vmax.f32 %v586_v44, %v777_v51  ;;  %v866_v3 = vmax.f32 %v663_v45, %v854_v52 }
 0x156   : > { %v781_v16 = vpop.f32.mrf.mxu0  ;;  %v858_v53 = vpop.f32.mrf.mxu1 }
 0x157   : > { %v867_v13 = vmax.f32 %v590_v46, %v781_v16  ;;  %v869_v14 = vmax.f32 %v667_v47, %v858_v53 }
 0x158   : > { %v783_v54 = vpop.f32.mrf.mxu0  ;;  %v860_v56 = vpop.f32.mrf.mxu1 }
 0x159   : > { %v868_v15 = vmax.f32 %v592_v48, %v783_v54  ;;  %v870_v17 = vmax.f32 %v669_v49, %v860_v56 }
 0x166   : > { %v974_v57 = vpop.f32.mrf.mxu0  ;;  %v1051_v58 = vpop.f32.mrf.mxu1 }
 0x167   : > { %v1062_v4 = vmax.f32 %v863_v62, %v974_v57  ;;  %v1064_v5 = vmax.f32 %v865_v63, %v1051_v58 }
 0x168   : > { %v976_v59 = vpop.f32.mrf.mxu0  ;;  %v1053_v19 = vpop.f32.mrf.mxu1 }
 0x169   : > { %v1063_v8 = vmax.f32 %v864_v2, %v976_v59  ;;  %v1065_v9 = vmax.f32 %v866_v3, %v1053_v19 }
 0x16c   : > { %v980_v60 = vpop.f32.mrf.mxu0  ;;  %v1057_v61 = vpop.f32.mrf.mxu1 }
 0x16d   : > { %v1066_v25 = vmax.f32 %v867_v13, %v980_v60  ;;  %v1068_v26 = vmax.f32 %v869_v14, %v1057_v61 }
 0x16e   : > { %v982_v0 = vpop.f32.mrf.mxu0  ;;  %v1059_v1 = vpop.f32.mrf.mxu1 }
 0x16f   : > { %v1067_v27 = vmax.f32 %v868_v15, %v982_v0  ;;  %v1069_v28 = vmax.f32 %v870_v17, %v1059_v1 }
 0x17c   : > { %v1173_v6 = vpop.f32.mrf.mxu0  ;;  %v1250_v7 = vpop.f32.mrf.mxu1 }
 0x17d   : > { %v1261_v11 = vmax.f32 %v1062_v4, %v1173_v6  ;;  %v1263_v12 = vmax.f32 %v1064_v5, %v1250_v7 }
 0x17e   : > { %v1175_v18 = vpop.f32.mrf.mxu0  ;;  %v1252_v20 = vpop.f32.mrf.mxu1 }
 0x17f   : > { %v1281_v21 = vadd.f32 %v1274_v10, %v1261_v11  ;;  %v1283_v22 = vadd.f32 %v1274_v10, %v1263_v12  ;;  %v1262_v23 = vmax.f32 %v1063_v8, %v1175_v18  ;;  %v1264_v24 = vmax.f32 %v1065_v9, %v1252_v20 }
 0x180   : > { %v1179_v29 = vpop.f32.mrf.mxu0  ;;  %v1256_v30 = vpop.f32.mrf.mxu1 }
 0x181   : > { %v1289_v31 = vmax.f32 %v1281_v21, 0.0  ;;  %v1291_v32 = vmax.f32 %v1283_v22, 0.0  ;;  %v1282_v33 = vadd.f32 %v1274_v10, %v1262_v23  ;;  %v1284_v34 = vadd.f32 %v1274_v10, %v1264_v24 }
 0x182   : > { %v1265_v35 = vmax.f32 %v1066_v25, %v1179_v29  ;;  %v1267_v36 = vmax.f32 %v1068_v26, %v1256_v30  ;;  %v1181_v37 = vpop.f32.mrf.mxu0  ;;  %v1258_v38 = vpop.f32.mrf.mxu1 }
 0x183   : > { %1297 = vst [vmem:[%s2165_s12] sm:$0xff] %v1289_v31  ;;  %1299 = vst [vmem:[%s2165_s12 + $0x10] sm:$0xff] %v1291_v32  ;;  %v1290_v39 = vmax.f32 %v1282_v33, 0.0  ;;  %v1292_v40 = vmax.f32 %v1284_v34, 0.0  ;;  %v1266_v42 = vmax.f32 %v1067_v27, %v1181_v37  ;;  %v1268_v43 = vmax.f32 %v1069_v28, %v1258_v38 }
 0x184   : > { %v1285_v44 = vadd.f32 %v1279_v41, %v1265_v35  ;;  %v1287_v45 = vadd.f32 %v1279_v41, %v1267_v36 }
 0x185   : > { %1298 = vst [vmem:[%s2165_s12 + $0x8] sm:$0xff] %v1290_v39  ;;  %1300 = vst [vmem:[%s2165_s12 + $0x18] sm:$0xff] %v1292_v40  ;;  %v1286_v46 = vadd.f32 %v1279_v41, %v1266_v42  ;;  %v1288_v47 = vadd.f32 %v1279_v41, %v1268_v43  ;;  %1311 = sbr.rel (!%p1646_p5) target bundleno = 402 (0x192), region = 59 }
 0x186   : > { %v1293_v48 = vmax.f32 %v1285_v44, 0.0  ;;  %v1295_v49 = vmax.f32 %v1287_v45, 0.0 }
 0x187   : > { %v1294_v55 = vmax.f32 %v1286_v46, 0.0  ;;  %v1296_v50 = vmax.f32 %v1288_v47, 0.0 }
 0x188   : > { %1301 = vst [vmem:[%s2165_s12 + $0x20] sm:$0xff] %v1293_v48  ;;  %1303 = vst [vmem:[%s2165_s12 + $0x30] sm:$0xff] %v1295_v49 }
 0x189   : > { %1302 = vst [vmem:[%s2165_s12 + $0x28] sm:$0xff] %v1294_v55  ;;  %1304 = vst [vmem:[%s2165_s12 + $0x38] sm:$0xff] %v1296_v50 }
 0x18a   : > { %v1327_v51 = vld [vmem:[%s2165_s12] sm:$0xff]  ;;  %v1331_v16 = vld [vmem:[%s2165_s12 + $0x10] sm:$0xff] }
 0x18b   : > { %1328 = vst [vmem:[%s1314_s23] sm:$0xff] %v1327_v51  ;;  %1332 = vst [vmem:[%s1314_s23 + $0x10] sm:$0xff] %v1331_v16 }
 0x18c   : > { %v1329_v52 = vld [vmem:[%s2165_s12 + $0x8] sm:$0xff]  ;;  %v1333_v53 = vld [vmem:[%s2165_s12 + $0x18] sm:$0xff] }
 0x18d   : > { %1330 = vst [vmem:[%s1314_s23 + $0x8] sm:$0xff] %v1329_v52  ;;  %1334 = vst [vmem:[%s1314_s23 + $0x18] sm:$0xff] %v1333_v53 }
 0x18f   : > { %v1335_v54 = vld [vmem:[%s2165_s12 + $0x20] sm:$0xff]  ;;  %v1339_v57 = vld [vmem:[%s2165_s12 + $0x30] sm:$0xff] }
 0x190   : > { %v1337_v56 = vld [vmem:[%s2165_s12 + $0x28] sm:$0xff]  ;;  %1336 = vst [vmem:[%s1314_s23 + $0x40] sm:$0xff] %v1335_v54  ;;  %v1341_v58 = vld [vmem:[%s2165_s12 + $0x38] sm:$0xff]  ;;  %1340 = vst [vmem:[%s1314_s23 + $0x50] sm:$0xff] %v1339_v57 }
 0x191   : > { %1338 = vst [vmem:[%s1314_s23 + $0x48] sm:$0xff] %v1337_v56  ;;  %1342 = vst [vmem:[%s1314_s23 + $0x58] sm:$0xff] %v1341_v58 }
 0x192 PF: > { %p10_p10 = scmp.ge.s32.totalorder %s1633_s16, 4   ;;  %s2205_s12 = smov %s1588_s13 }
 0x193   : > { %s2206_s13 = smov %s1644_s19  ;;  %s2207_s14 = smov %s1633_s16 }
 0x194   :  { %12 = sbr.rel (!%p10_p10) target bundleno = 2 (0x2), region = 116 }

// kernel: _lambda_.6
= control target key start
LH: loop header
LB: loop body
LE: loop exit
PB: predicated region body
PF: predicated region fallthrough
CT: control target
= control target key end

     0   :  { %v741_v3 = vmov 0   ;;  %vm58_vm0 = vcmask 130048   ;;  %s1306_s0 = inlined_call_operand.vmem [shape: f32[4,144,256], index: 0, kind: input, shape index: {}]   ;;  %s1307_s1 = inlined_call_operand.vmem [shape: f32[32,144], index: 1, kind: input, shape index: {}]   ;;  %s1308_s2 = inlined_call_operand.vmem [shape: f32[32,1], index: 2, kind: input, shape index: {}]   ;;  %s1309_s3 = inlined_call_operand.vmem [shape: f32[32,256], index: 3, kind: output, shape index: {}]  }
   0x1   :  { %v53_v0 = vld [vmem:[%s1306_s0 + $0xf8] sm:$0xff]  ;;  %v52_v2 = vld [vmem:[%s1306_s0 + $0xf0] sm:$0xff]  ;;  %739 = vset.pattern.permute.xlu0 %v741_v3  ;;  %740 = vset.pattern.permute.xlu1 %v741_v3  ;;  %v51_v5 = vld [vmem:[%s1306_s0 + $0xe8] sm:$0xff] }
   0x2   :  { %v649_v1 = vld [vmem:[%s1306_s0 + $0x218] sm:$0xff]  ;;  %71 = vmatprep.subr.mxu0 %v53_v0  ;;  %v648_v4 = vld [vmem:[%s1306_s0 + $0x210] sm:$0xff]  ;;  %v647_v6 = vld [vmem:[%s1306_s0 + $0x208] sm:$0xff] }
   0x3   :  { %197 = vmatprep.subr.mxu1 %v649_v1  ;;  %72 = vmatpush1.msra.mxu0 %v52_v2  ;;  %v50_v7 = vld [vmem:[%s1306_s0 + $0xe0] sm:$0xff]  ;;  %v49_v9 = vld [vmem:[%s1306_s0 + $0xd8] sm:$0xff]  ;;  %v48_v11 = vld [vmem:[%s1306_s0 + $0xd0] sm:$0xff] }
   0x4   :  { %198 = vmatpush1.msra.mxu1 %v648_v4  ;;  %v646_v8 = vld [vmem:[%s1306_s0 + $0x200] sm:$0xff]  ;;  %73 = vmatprep.subr.mxu0 %v51_v5  ;;  %v645_v10 = vld [vmem:[%s1306_s0 + $0x1f8] sm:$0xff]  ;;  %v644_v12 = vld [vmem:[%s1306_s0 + $0x1f0] sm:$0xff] }
   0x5   :  { %199 = vmatprep.subr.mxu1 %v647_v6  ;;  %74 = vmatpush1.msra.mxu0 %v50_v7  ;;  %v47_v13 = vld [vmem:[%s1306_s0 + $0xc8] sm:$0xff]  ;;  %v46_v15 = vld [vmem:[%s1306_s0 + $0xc0] sm:$0xff]  ;;  %v45_v17 = vld [vmem:[%s1306_s0 + $0xb8] sm:$0xff] }
   0x6   :  { %200 = vmatpush1.msra.mxu1 %v646_v8  ;;  %v643_v14 = vld [vmem:[%s1306_s0 + $0x1e8] sm:$0xff]  ;;  %75 = vmatprep.subr.mxu0 %v49_v9  ;;  %v642_v16 = vld [vmem:[%s1306_s0 + $0x1e0] sm:$0xff]  ;;  %v641_v18 = vld [vmem:[%s1306_s0 + $0x1d8] sm:$0xff] }
   0x7   :  { %201 = vmatprep.subr.mxu1 %v645_v10  ;;  %76 = vmatpush1.msra.mxu0 %v48_v11  ;;  %v44_v19 = vld [vmem:[%s1306_s0 + $0xb0] sm:$0xff]  ;;  %v43_v21 = vld [vmem:[%s1306_s0 + $0xa8] sm:$0xff]  ;;  %v42_v23 = vld [vmem:[%s1306_s0 + $0xa0] sm:$0xff] }
   0x8   :  { %202 = vmatpush1.msra.mxu1 %v644_v12  ;;  %77 = vmatprep.subr.mxu0 %v47_v13  ;;  %v640_v20 = vld [vmem:[%s1306_s0 + $0x1d0] sm:$0xff]  ;;  %v639_v22 = vld [vmem:[%s1306_s0 + $0x1c8] sm:$0xff]  ;;  %v638_v24 = vld [vmem:[%s1306_s0 + $0x1c0] sm:$0xff] }
   0x9   :  { %203 = vmatprep.subr.mxu1 %v643_v14  ;;  %78 = vmatpush1.msra.mxu0 %v46_v15  ;;  %v41_v25 = vld [vmem:[%s1306_s0 + $0x98] sm:$0xff]  ;;  %v40_v27 = vld [vmem:[%s1306_s0 + $0x90] sm:$0xff]  ;;  %v39_v29 = vld [vmem:[%s1306_s0 + $0x88] sm:$0xff] }
   0xa   :  { %204 = vmatpush1.msra.mxu1 %v642_v16  ;;  %79 = vmatprep.subr.mxu0 %v45_v17  ;;  %v637_v26 = vld [vmem:[%s1306_s0 + $0x1b8] sm:$0xff]  ;;  %v636_v28 = vld [vmem:[%s1306_s0 + $0x1b0] sm:$0xff]  ;;  %v635_v30 = vld [vmem:[%s1306_s0 + $0x1a8] sm:$0xff] }
   0xb   :  { %205 = vmatprep.subr.mxu1 %v641_v18  ;;  %80 = vmatpush1.msra.mxu0 %v44_v19  ;;  %v38_v31 = vld [vmem:[%s1306_s0 + $0x80] sm:$0xff]  ;;  %v37_v33 = vld [vmem:[%s1306_s0 + $0x78] sm:$0xff]  ;;  %v36_v35 = vld [vmem:[%s1306_s0 + $0x70] sm:$0xff] }
   0xc   :  { %206 = vmatpush1.msra.mxu1 %v640_v20  ;;  %81 = vmatprep.subr.mxu0 %v43_v21  ;;  %v634_v32 = vld [vmem:[%s1306_s0 + $0x1a0] sm:$0xff]  ;;  %v633_v34 = vld [vmem:[%s1306_s0 + $0x198] sm:$0xff]  ;;  %v632_v36 = vld [vmem:[%s1306_s0 + $0x190] sm:$0xff] }
   0xd   :  { %207 = vmatprep.subr.mxu1 %v639_v22  ;;  %82 = vmatpush1.msra.mxu0 %v42_v23  ;;  %v35_v37 = vld [vmem:[%s1306_s0 + $0x68] sm:$0xff]  ;;  %v34_v39 = vld [vmem:[%s1306_s0 + $0x60] sm:$0xff]  ;;  %v33_v41 = vld [vmem:[%s1306_s0 + $0x58] sm:$0xff] }
   0xe   :  { %208 = vmatpush1.msra.mxu1 %v638_v24  ;;  %83 = vmatprep.subr.mxu0 %v41_v25  ;;  %v631_v38 = vld [vmem:[%s1306_s0 + $0x188] sm:$0xff]  ;;  %v630_v40 = vld [vmem:[%s1306_s0 + $0x180] sm:$0xff]  ;;  %v629_v42 = vld [vmem:[%s1306_s0 + $0x178] sm:$0xff] }
   0xf   :  { %209 = vmatprep.subr.mxu1 %v637_v26  ;;  %84 = vmatpush1.msra.mxu0 %v40_v27  ;;  %v32_v43 = vld [vmem:[%s1306_s0 + $0x50] sm:$0xff]  ;;  %v31_v45 = vld [vmem:[%s1306_s0 + $0x48] sm:$0xff]  ;;  %v30_v47 = vld [vmem:[%s1306_s0 + $0x40] sm:$0xff] }
  0x10   :  { %210 = vmatpush1.msra.mxu1 %v636_v28  ;;  %85 = vmatprep.subr.mxu0 %v39_v29  ;;  %v628_v44 = vld [vmem:[%s1306_s0 + $0x170] sm:$0xff]  ;;  %v627_v46 = vld [vmem:[%s1306_s0 + $0x168] sm:$0xff]  ;;  %v626_v48 = vld [vmem:[%s1306_s0 + $0x160] sm:$0xff] }
  0x11   :  { %211 = vmatprep.subr.mxu1 %v635_v30  ;;  %86 = vmatpush1.msra.mxu0 %v38_v31  ;;  %v29_v49 = vld [vmem:[%s1306_s0 + $0x38] sm:$0xff]  ;;  %v28_v51 = vld [vmem:[%s1306_s0 + $0x30] sm:$0xff]  ;;  %v27_v53 = vld [vmem:[%s1306_s0 + $0x28] sm:$0xff] }
  0x12   :  { %212 = vmatpush1.msra.mxu1 %v634_v32  ;;  %87 = vmatprep.subr.mxu0 %v37_v33  ;;  %v625_v50 = vld [vmem:[%s1306_s0 + $0x158] sm:$0xff]  ;;  %v624_v52 = vld [vmem:[%s1306_s0 + $0x150] sm:$0xff]  ;;  %v623_v54 = vld [vmem:[%s1306_s0 + $0x148] sm:$0xff] }
  0x13   :  { %213 = vmatprep.subr.mxu1 %v633_v34  ;;  %88 = vmatpush1.msra.mxu0 %v36_v35  ;;  %v26_v55 = vld [vmem:[%s1306_s0 + $0x20] sm:$0xff]  ;;  %v25_v57 = vld [vmem:[%s1306_s0 + $0x18] sm:$0xff]  ;;  %v24_v59 = vld [vmem:[%s1306_s0 + $0x10] sm:$0xff] }
  0x14   :  { %214 = vmatpush1.msra.mxu1 %v632_v36  ;;  %89 = vmatprep.subr.mxu0 %v35_v37  ;;  %v622_v56 = vld [vmem:[%s1306_s0 + $0x140] sm:$0xff]  ;;  %v621_v58 = vld [vmem:[%s1306_s0 + $0x138] sm:$0xff]  ;;  %v620_v60 = vld [vmem:[%s1306_s0 + $0x130] sm:$0xff] }
  0x15   :  { %215 = vmatprep.subr.mxu1 %v631_v38  ;;  %90 = vmatpush1.msra.mxu0 %v34_v39  ;;  %v23_v61 = vld [vmem:[%s1306_s0 + $0x8] sm:$0xff]  ;;  %v22_v63 = vld [vmem:[%s1306_s0] sm:$0xff]  ;;  %v57_v1 = vld [vmem:[%s1306_s0 + $0x118] sm:$0xff] }
  0x16   :  { %216 = vmatpush1.msra.mxu1 %v630_v40  ;;  %91 = vmatprep.subr.mxu0 %v33_v41  ;;  %v619_v62 = vld [vmem:[%s1306_s0 + $0x128] sm:$0xff]  ;;  %v618_v0 = vld [vmem:[%s1306_s0 + $0x120] sm:$0xff]  ;;  %v653_v2 = vld [vmem:[%s1306_s0 + $0x238] sm:$0xff] }
  0x17   :  { %217 = vmatprep.subr.mxu1 %v629_v42  ;;  %92 = vmatpush1.msra.mxu0 %v32_v43  ;;  %v56_v3 = vld [vmem:[%s1306_s0 + $0x110] sm:$0xff]  ;;  %v55_v5 = vld [vmem:[%s1306_s0 + $0x108] sm:$0xff]  ;;  %v54_v7 = vld [vmem:[%s1306_s0 + $0x100] sm:$0xff] }
  0x18   :  { %218 = vmatpush1.msra.mxu1 %v628_v44  ;;  %93 = vmatprep.subr.mxu0 %v31_v45  ;;  %v652_v4 = vld [vmem:[%s1306_s0 + $0x230] sm:$0xff]  ;;  %v651_v6 = vld [vmem:[%s1306_s0 + $0x228] sm:$0xff]  ;;  %v650_v9 = vld [vmem:[%s1306_s0 + $0x220] sm:$0xff] }
  0x19   :  { %219 = vmatprep.subr.mxu1 %v627_v46  ;;  %94 = vmatpush1.msra.mxu0 %v30_v47  ;;  %v978_v8 = vld [vmem:[%s1307_s1 + $0x8] sm:$0xff]  ;;  %v986_v10 = vld [vmem:[%s1307_s1] sm:$0xff]  ;;  %v689_v11 = vld [vmem:[%s1306_s0 + $0x338] sm:$0xff] }
  0x1a   :  { %220 = vmatpush1.msra.mxu1 %v626_v48  ;;  %95 = vmatprep.subr.mxu0 %v29_v49  ;;  %v729_v12 = vld [vmem:[%s1306_s0 + $0x458] sm:$0xff]  ;;  %v688_v13 = vld [vmem:[%s1306_s0 + $0x330] sm:$0xff]  ;;  %v687_v15 = vld [vmem:[%s1306_s0 + $0x328] sm:$0xff] }
  0x1b   :  { %221 = vmatprep.subr.mxu1 %v625_v50  ;;  %96 = vmatpush1.msra.mxu0 %v28_v51  ;;  %v728_v14 = vld [vmem:[%s1306_s0 + $0x450] sm:$0xff]  ;;  %v727_v16 = vld [vmem:[%s1306_s0 + $0x448] sm:$0xff]  ;;  %v686_v17 = vld [vmem:[%s1306_s0 + $0x320] sm:$0xff] }
  0x1c   :  { %222 = vmatpush1.msra.mxu1 %v624_v52  ;;  %97 = vmatprep.subr.mxu0 %v27_v53  ;;  %v726_v18 = vld [vmem:[%s1306_s0 + $0x440] sm:$0xff]  ;;  %v685_v19 = vld [vmem:[%s1306_s0 + $0x318] sm:$0xff]  ;;  %v684_v21 = vld [vmem:[%s1306_s0 + $0x310] sm:$0xff] }
  0x1d   :  { %223 = vmatprep.subr.mxu1 %v623_v54  ;;  %98 = vmatpush1.msra.mxu0 %v26_v55  ;;  %v725_v20 = vld [vmem:[%s1306_s0 + $0x438] sm:$0xff]  ;;  %v724_v22 = vld [vmem:[%s1306_s0 + $0x430] sm:$0xff]  ;;  %v683_v23 = vld [vmem:[%s1306_s0 + $0x308] sm:$0xff] }
  0x1e   :  { %224 = vmatpush1.msra.mxu1 %v622_v56  ;;  %99 = vmatprep.subr.mxu0 %v25_v57  ;;  %v723_v24 = vld [vmem:[%s1306_s0 + $0x428] sm:$0xff]  ;;  %v682_v25 = vld [vmem:[%s1306_s0 + $0x300] sm:$0xff]  ;;  %v681_v27 = vld [vmem:[%s1306_s0 + $0x2f8] sm:$0xff] }
  0x1f   :  { %225 = vmatprep.subr.mxu1 %v621_v58  ;;  %100 = vmatpush1.msra.mxu0 %v24_v59  ;;  %v722_v26 = vld [vmem:[%s1306_s0 + $0x420] sm:$0xff]  ;;  %v721_v28 = vld [vmem:[%s1306_s0 + $0x418] sm:$0xff]  ;;  %v680_v29 = vld [vmem:[%s1306_s0 + $0x2f0] sm:$0xff] }
  0x20   :  { %226 = vmatpush1.msra.mxu1 %v620_v60  ;;  %101 = vmatprep.subr.mxu0 %v23_v61  ;;  %v720_v30 = vld [vmem:[%s1306_s0 + $0x410] sm:$0xff]  ;;  %v679_v31 = vld [vmem:[%s1306_s0 + $0x2e8] sm:$0xff]  ;;  %v678_v33 = vld [vmem:[%s1306_s0 + $0x2e0] sm:$0xff] }
  0x21   :  { %227 = vmatprep.subr.mxu1 %v619_v62  ;;  %102 = vmatpush1.msra.mxu0 %v22_v63  ;;  %v719_v32 = vld [vmem:[%s1306_s0 + $0x408] sm:$0xff]  ;;  %v718_v34 = vld [vmem:[%s1306_s0 + $0x400] sm:$0xff]  ;;  %v677_v35 = vld [vmem:[%s1306_s0 + $0x2d8] sm:$0xff] }
  0x22   :  { %228 = vmatpush1.msra.mxu1 %v618_v0  ;;  %131 = vmatprep.subr.mxu0 %v57_v1  ;;  %v717_v36 = vld [vmem:[%s1306_s0 + $0x3f8] sm:$0xff]  ;;  %v676_v37 = vld [vmem:[%s1306_s0 + $0x2d0] sm:$0xff]  ;;  %v675_v39 = vld [vmem:[%s1306_s0 + $0x2c8] sm:$0xff] }
  0x23   :  { %257 = vmatprep.subr.mxu1 %v653_v2  ;;  %132 = vmatpush2.msra.mxu0 %v56_v3  ;;  %v716_v38 = vld [vmem:[%s1306_s0 + $0x3f0] sm:$0xff]  ;;  %v715_v40 = vld [vmem:[%s1306_s0 + $0x3e8] sm:$0xff]  ;;  %v674_v41 = vld [vmem:[%s1306_s0 + $0x2c0] sm:$0xff] }
  0x24   :  { %258 = vmatpush2.msra.mxu1 %v652_v4  ;;  %133 = vmatprep.subr.mxu0 %v55_v5  ;;  %v714_v42 = vld [vmem:[%s1306_s0 + $0x3e0] sm:$0xff]  ;;  %v673_v43 = vld [vmem:[%s1306_s0 + $0x2b8] sm:$0xff]  ;;  %v672_v45 = vld [vmem:[%s1306_s0 + $0x2b0] sm:$0xff] }
  0x25   :  { %259 = vmatprep.subr.mxu1 %v651_v6  ;;  %134 = vmatpush2.msra.mxu0 %v54_v7  ;;  %v713_v44 = vld [vmem:[%s1306_s0 + $0x3d8] sm:$0xff]  ;;  %v712_v46 = vld [vmem:[%s1306_s0 + $0x3d0] sm:$0xff]  ;;  %v671_v47 = vld [vmem:[%s1306_s0 + $0x2a8] sm:$0xff] }
  0x26   :  { %614 = vmatprep.mubr.msk.f32.mxu0 %vm58_vm0, %v978_v8  ;;  %260 = vmatpush2.msra.mxu1 %v650_v9  ;;  %v711_v48 = vld [vmem:[%s1306_s0 + $0x3c8] sm:$0xff]  ;;  %v670_v49 = vld [vmem:[%s1306_s0 + $0x2a0] sm:$0xff]  ;;  %v669_v51 = vld [vmem:[%s1306_s0 + $0x298] sm:$0xff] }
  0x27   :  { %654 = vmatprep.mubr.msk.f32.mxu1 %vm58_vm0, %v978_v8  ;;  %136 = vmatmul.mubr.f32.vlgmr.msra.gmra.mxu0 %v986_v10  ;;  %v710_v50 = vld [vmem:[%s1306_s0 + $0x3c0] sm:$0xff]  ;;  %v709_v52 = vld [vmem:[%s1306_s0 + $0x3b8] sm:$0xff]  ;;  %v668_v54 = vld [vmem:[%s1306_s0 + $0x290] sm:$0xff] }
  0x28   :  { %262 = vmatmul.mubr.f32.vlgmr.msra.gmra.mxu1 %v986_v10  ;;  %331 = vmatprep.subr.mxu0 %v689_v11  ;;  %v1123_v53 = vld [vmem:[%s1307_s1 + $0x18] sm:$0xff]  ;;  %v708_v55 = vld [vmem:[%s1306_s0 + $0x3b0] sm:$0xff]  ;;  %v667_v57 = vld [vmem:[%s1306_s0 + $0x288] sm:$0xff] }
  0x29   :  { %465 = vmatprep.subr.mxu1 %v729_v12  ;;  %332 = vmatpush1.msra.mxu0 %v688_v13  ;;  %v1134_v56 = vld [vmem:[%s1307_s1 + $0x10] sm:$0xff]  ;;  %v707_v58 = vld [vmem:[%s1306_s0 + $0x3a8] sm:$0xff]  ;;  %v666_v59 = vld [vmem:[%s1306_s0 + $0x280] sm:$0xff] }
  0x2a   :  { %466 = vmatpush1.msra.mxu1 %v728_v14  ;;  %333 = vmatprep.subr.mxu0 %v687_v15  ;;  %v706_v60 = vld [vmem:[%s1306_s0 + $0x3a0] sm:$0xff]  ;;  %v665_v61 = vld [vmem:[%s1306_s0 + $0x278] sm:$0xff]  ;;  %v1163_v63 = vld [vmem:[%s1307_s1 + $0x28] sm:$0xff] }
  0x2b   :  { %467 = vmatprep.subr.mxu1 %v727_v16  ;;  %334 = vmatpush1.msra.mxu0 %v686_v17  ;;  %v705_v62 = vld [vmem:[%s1306_s0 + $0x398] sm:$0xff]  ;;  %v664_v0 = vld [vmem:[%s1306_s0 + $0x270] sm:$0xff]  ;;  %v1174_v2 = vld [vmem:[%s1307_s1 + $0x20] sm:$0xff] }
  0x2c   :  { %468 = vmatpush1.msra.mxu1 %v726_v18  ;;  %335 = vmatprep.subr.mxu0 %v685_v19  ;;  %v704_v1 = vld [vmem:[%s1306_s0 + $0x390] sm:$0xff]  ;;  %v663_v3 = vld [vmem:[%s1306_s0 + $0x268] sm:$0xff]  ;;  %v662_v5 = vld [vmem:[%s1306_s0 + $0x260] sm:$0xff] }
  0x2d   :  { %469 = vmatprep.subr.mxu1 %v725_v20  ;;  %336 = vmatpush1.msra.mxu0 %v684_v21  ;;  %v703_v4 = vld [vmem:[%s1306_s0 + $0x388] sm:$0xff]  ;;  %v702_v6 = vld [vmem:[%s1306_s0 + $0x380] sm:$0xff]  ;;  %v661_v7 = vld [vmem:[%s1306_s0 + $0x258] sm:$0xff] }
  0x2e   :  { %470 = vmatpush1.msra.mxu1 %v724_v22  ;;  %337 = vmatprep.subr.mxu0 %v683_v23  ;;  %v701_v9 = vld [vmem:[%s1306_s0 + $0x378] sm:$0xff]  ;;  %v660_v12 = vld [vmem:[%s1306_s0 + $0x250] sm:$0xff]  ;;  %v659_v15 = vld [vmem:[%s1306_s0 + $0x248] sm:$0xff] }
  0x2f   :  { %471 = vmatprep.subr.mxu1 %v723_v24  ;;  %338 = vmatpush1.msra.mxu0 %v682_v25  ;;  %v21_v11 = vld [vmem:[%s1307_s1 + $0x38] sm:$0xff]  ;;  %v700_v13 = vld [vmem:[%s1306_s0 + $0x370] sm:$0xff]  ;;  %v699_v16 = vld [vmem:[%s1306_s0 + $0x368] sm:$0xff] }
  0x30   :  { %472 = vmatpush1.msra.mxu1 %v722_v26  ;;  %339 = vmatprep.subr.mxu0 %v681_v27  ;;  %v20_v14 = vld [vmem:[%s1307_s1 + $0x30] sm:$0xff]  ;;  %v658_v17 = vld [vmem:[%s1306_s0 + $0x240] sm:$0xff]  ;;  %v693_v19 = vld [vmem:[%s1306_s0 + $0x358] sm:$0xff] }
  0x31   :  { %473 = vmatprep.subr.mxu1 %v721_v28  ;;  %340 = vmatpush1.msra.mxu0 %v680_v29  ;;  %v698_v18 = vld [vmem:[%s1306_s0 + $0x360] sm:$0xff]  ;;  %v733_v20 = vld [vmem:[%s1306_s0 + $0x478] sm:$0xff]  ;;  %v692_v21 = vld [vmem:[%s1306_s0 + $0x350] sm:$0xff] }
  0x32   :  { %474 = vmatpush1.msra.mxu1 %v720_v30  ;;  %341 = vmatprep.subr.mxu0 %v679_v31  ;;  %v732_v22 = vld [vmem:[%s1306_s0 + $0x470] sm:$0xff]  ;;  %v691_v23 = vld [vmem:[%s1306_s0 + $0x348] sm:$0xff]  ;;  %v690_v25 = vld [vmem:[%s1306_s0 + $0x340] sm:$0xff] }
  0x33   :  { %475 = vmatprep.subr.mxu1 %v719_v32  ;;  %342 = vmatpush1.msra.mxu0 %v678_v33  ;;  %v731_v24 = vld [vmem:[%s1306_s0 + $0x468] sm:$0xff]  ;;  %v730_v26 = vld [vmem:[%s1306_s0 + $0x460] sm:$0xff]  ;;  %v564_v28 = vld [vmem:[%s1308_s2 + $0x10] sm:$0xff] }
  0x34   :  { %476 = vmatpush1.msra.mxu1 %v718_v34  ;;  %343 = vmatprep.subr.mxu0 %v677_v35  ;;  %v562_v27 = vld [vmem:[%s1308_s2] sm:$0xff]  ;;  %v565_v29 = vld [vmem:[%s1308_s2 + $0x18] sm:$0xff] }
  0x35   :  { %477 = vmatprep.subr.mxu1 %v717_v36  ;;  %344 = vmatpush1.msra.mxu0 %v676_v37 }
  0x36   :  { %478 = vmatpush1.msra.mxu1 %v716_v38  ;;  %345 = vmatprep.subr.mxu0 %v675_v39 }
  0x37   :  { %479 = vmatprep.subr.mxu1 %v715_v40  ;;  %346 = vmatpush1.msra.mxu0 %v674_v41 }
  0x38   :  { %480 = vmatpush1.msra.mxu1 %v714_v42  ;;  %347 = vmatprep.subr.mxu0 %v673_v43 }
  0x39   :  { %481 = vmatprep.subr.mxu1 %v713_v44  ;;  %348 = vmatpush1.msra.mxu0 %v672_v45 }
  0x3a   :  { %482 = vmatpush1.msra.mxu1 %v712_v46  ;;  %349 = vmatprep.subr.mxu0 %v671_v47 }
  0x3b   :  { %483 = vmatprep.subr.mxu1 %v711_v48  ;;  %350 = vmatpush1.msra.mxu0 %v670_v49 }
  0x3c   :  { %484 = vmatpush1.msra.mxu1 %v710_v50  ;;  %351 = vmatprep.subr.mxu0 %v669_v51 }
  0x3d   :  { %485 = vmatprep.subr.mxu1 %v709_v52  ;;  %615 = vmatprep.mubr.msk.f32.mxu0 %vm58_vm0, %v1123_v53 }
  0x3e   :  { %655 = vmatprep.mubr.msk.f32.mxu1 %vm58_vm0, %v1123_v53  ;;  %352 = vmatpush1.msra.mxu0 %v668_v54 }
  0x3f   :  { %486 = vmatpush1.msra.mxu1 %v708_v55  ;;  %142 = vmatmul.mubr.f32.gmra.mxu0 %v1134_v56 }
  0x40   :  { %268 = vmatmul.mubr.f32.gmra.mxu1 %v1134_v56  ;;  %353 = vmatprep.subr.mxu0 %v667_v57 }
  0x41   :  { %487 = vmatprep.subr.mxu1 %v707_v58  ;;  %354 = vmatpush1.msra.mxu0 %v666_v59 }
  0x42   :  { %488 = vmatpush1.msra.mxu1 %v706_v60  ;;  %355 = vmatprep.subr.mxu0 %v665_v61 }
  0x43   :  { %489 = vmatprep.subr.mxu1 %v705_v62  ;;  %616 = vmatprep.mubr.msk.f32.mxu0 %vm58_vm0, %v1163_v63 }
  0x44   :  { %656 = vmatprep.mubr.msk.f32.mxu1 %vm58_vm0, %v1163_v63  ;;  %356 = vmatpush1.msra.mxu0 %v664_v0 }
  0x45   :  { %490 = vmatpush1.msra.mxu1 %v704_v1  ;;  %148 = vmatmul.mubr.f32.gmra.mxu0 %v1174_v2 }
  0x46   :  { %274 = vmatmul.mubr.f32.gmra.mxu1 %v1174_v2  ;;  %357 = vmatprep.subr.mxu0 %v663_v3 }
  0x47   :  { %491 = vmatprep.subr.mxu1 %v703_v4  ;;  %358 = vmatpush1.msra.mxu0 %v662_v5 }
  0x48   :  { %492 = vmatpush1.msra.mxu1 %v702_v6  ;;  %359 = vmatprep.subr.mxu0 %v661_v7 }
  0x49   :  { %493 = vmatprep.subr.mxu1 %v701_v9  ;;  %617 = vmatprep.mubr.msk.f32.mxu0 %vm58_vm0, %v21_v11 }
  0x4a   :  { %657 = vmatprep.mubr.msk.f32.mxu1 %vm58_vm0, %v21_v11  ;;  %360 = vmatpush1.msra.mxu0 %v660_v12 }
  0x4b   :  { %494 = vmatpush1.msra.mxu1 %v700_v13  ;;  %154 = vmatmul.mubr.f32.gmra.mxu0 %v20_v14 }
  0x4c   :  { %280 = vmatmul.mubr.f32.gmra.mxu1 %v20_v14  ;;  %361 = vmatprep.subr.mxu0 %v659_v15 }
  0x4d   :  { %495 = vmatprep.subr.mxu1 %v699_v16  ;;  %362 = vmatpush1.msra.mxu0 %v658_v17 }
  0x4e   :  { %496 = vmatpush1.msra.mxu1 %v698_v18  ;;  %391 = vmatprep.subr.mxu0 %v693_v19 }
  0x4f   :  { %525 = vmatprep.subr.mxu1 %v733_v20  ;;  %392 = vmatpush2.msra.mxu0 %v692_v21 }
  0x50   :  { %526 = vmatpush2.msra.mxu1 %v732_v22  ;;  %393 = vmatprep.subr.mxu0 %v691_v23 }
  0x51   :  { %527 = vmatprep.subr.mxu1 %v731_v24  ;;  %394 = vmatpush2.msra.mxu0 %v690_v25 }
  0x52   :  { %694 = vmatprep.mubr.msk.f32.mxu0 %vm58_vm0, %v978_v8  ;;  %528 = vmatpush2.msra.mxu1 %v730_v26 }
  0x53   :  { %734 = vmatprep.mubr.msk.f32.mxu1 %vm58_vm0, %v978_v8  ;;  %396 = vmatmul.mubr.f32.vlgmr.msra.gmra.mxu0 %v986_v10  ;;  %v563_v8 = vld [vmem:[%s1308_s2 + $0x8] sm:$0xff] }
  0x54   :  { %530 = vmatmul.mubr.f32.vlgmr.msra.gmra.mxu1 %v986_v10  ;;  %695 = vmatprep.mubr.msk.f32.mxu0 %vm58_vm0, %v1123_v53 }
  0x55   :  { %735 = vmatprep.mubr.msk.f32.mxu1 %vm58_vm0, %v1123_v53  ;;  %568 = vperm.xlu0 %739, %v562_v27  }
  0x56   :  { %578 = vperm.xlu1 %740, %v564_v28  }
  0x57   :  { %402 = vmatmul.mubr.f32.gmra.mxu0 %v1134_v56 }
  0x58   :  { %536 = vmatmul.mubr.f32.gmra.mxu1 %v1134_v56  ;;  %696 = vmatprep.mubr.msk.f32.mxu0 %vm58_vm0, %v1163_v63 }
  0x59   :  { %736 = vmatprep.mubr.msk.f32.mxu1 %vm58_vm0, %v1163_v63  ;;  %573 = vperm.xlu0 %739, %v563_v8  }
  0x5a   :  { %583 = vperm.xlu1 %740, %v565_v29  }
  0x5b   :  { %408 = vmatmul.mubr.f32.gmra.mxu0 %v1174_v2 }
  0x5c   :  { %542 = vmatmul.mubr.f32.gmra.mxu1 %v1174_v2  ;;  %697 = vmatprep.mubr.msk.f32.mxu0 %vm58_vm0, %v21_v11 }
  0x5d   :  { %737 = vmatprep.mubr.msk.f32.mxu1 %vm58_vm0, %v21_v11 }
  0x5f   :  { %414 = vmatmul.mubr.f32.gmra.mxu0 %v20_v14 }
  0x60   :  { %548 = vmatmul.mubr.f32.gmra.mxu1 %v20_v14 }
  0xd0   :  { %v569_v46 = vpop.permute.xlu0 %568 }
  0xd1   :  { %v579_v15 = vpop.permute.xlu1 %578 }
  0xd4   :  { %v574_v62 = vpop.permute.xlu0 %573 }
  0xe7   :  { %v137_v10 = vpop.f32.mrf.mxu0 }
  0xe8   :  { %v263_v30 = vpop.f32.mrf.mxu1 }
  0xe9   :  { %v139_v31 = vpop.f32.mrf.mxu0  ;;  %v286_v45 = vmax.f32 %v137_v10, %v263_v30 }
  0xea   :  { %v265_v32 = vpop.f32.mrf.mxu1 }
  0xeb   :  { %v287_v49 = vmax.f32 %v139_v31, %v265_v32 }
  0xff   :  { %v143_v33 = vpop.f32.mrf.mxu0 }
 0x100   :  { %v269_v34 = vpop.f32.mrf.mxu1 }
 0x101   :  { %v145_v35 = vpop.f32.mrf.mxu0  ;;  %v288_v53 = vmax.f32 %v143_v33, %v269_v34  ;;  %v584_v33 = vpop.permute.xlu1 %583 }
 0x102   :  { %v271_v36 = vpop.f32.mrf.mxu1 }
 0x103   :  { %v289_v58 = vmax.f32 %v145_v35, %v271_v36 }
 0x105   :  { %v149_v37 = vpop.f32.mrf.mxu0 }
 0x106   :  { %v275_v38 = vpop.f32.mrf.mxu1 }
 0x107   :  { %v151_v39 = vpop.f32.mrf.mxu0  ;;  %v290_v63 = vmax.f32 %v149_v37, %v275_v38 }
 0x108   :  { %v277_v40 = vpop.f32.mrf.mxu1 }
 0x109   :  { %v291_v6 = vmax.f32 %v151_v39, %v277_v40 }
 0x10b   :  { %v155_v41 = vpop.f32.mrf.mxu0 }
 0x10c   :  { %v281_v42 = vpop.f32.mrf.mxu1 }
 0x10d   :  { %v157_v43 = vpop.f32.mrf.mxu0  ;;  %v292_v16 = vmax.f32 %v155_v41, %v281_v42 }
 0x10e   :  { %v283_v44 = vpop.f32.mrf.mxu1 }
 0x10f   :  { %v293_v23 = vmax.f32 %v157_v43, %v283_v44 }
 0x113   :  { %v397_v47 = vpop.f32.mrf.mxu0 }
 0x114   :  { %v531_v48 = vpop.f32.mrf.mxu1  ;;  %v420_v50 = vmax.f32 %v286_v45, %v397_v47 }
 0x115   :  { %v399_v51 = vpop.f32.mrf.mxu0 }
 0x116   :  { %v533_v52 = vpop.f32.mrf.mxu1  ;;  %v554_v54 = vmax.f32 %v420_v50, %v531_v48  ;;  %v421_v55 = vmax.f32 %v287_v49, %v399_v51 }
 0x117   :  { %v403_v56 = vpop.f32.mrf.mxu0 }
 0x118   :  { %v537_v57 = vpop.f32.mrf.mxu1  ;;  %v555_v59 = vmax.f32 %v421_v55, %v533_v52  ;;  %v586_v60 = vadd.f32 %v569_v46, %v554_v54  ;;  %v422_v61 = vmax.f32 %v288_v53, %v403_v56 }
 0x119   :  { %v405_v0 = vpop.f32.mrf.mxu0 }
 0x11a   :  { %v539_v1 = vpop.f32.mrf.mxu1  ;;  %v587_v2 = vadd.f32 %v569_v46, %v555_v59  ;;  %v594_v3 = vmax.f32 %v586_v60, 0.0  ;;  %v556_v4 = vmax.f32 %v422_v61, %v537_v57  ;;  %v423_v5 = vmax.f32 %v289_v58, %v405_v0 }
 0x11b   :  { %v409_v7 = vpop.f32.mrf.mxu0 }
 0x11c   :  { %v543_v9 = vpop.f32.mrf.mxu1  ;;  %v595_v11 = vmax.f32 %v587_v2, 0.0  ;;  %602 = vst [vmem:[%s1309_s3] sm:$0xff] %v594_v3  ;;  %v557_v12 = vmax.f32 %v423_v5, %v539_v1  ;;  %v588_v13 = vadd.f32 %v574_v62, %v556_v4  ;;  %v424_v14 = vmax.f32 %v290_v63, %v409_v7 }
 0x11d   :  { %v411_v17 = vpop.f32.mrf.mxu0 }
 0x11e   :  { %v545_v18 = vpop.f32.mrf.mxu1  ;;  %603 = vst [vmem:[%s1309_s3 + $0x8] sm:$0xff] %v595_v11  ;;  %v589_v19 = vadd.f32 %v574_v62, %v557_v12  ;;  %v596_v20 = vmax.f32 %v588_v13, 0.0  ;;  %v558_v21 = vmax.f32 %v424_v14, %v543_v9  ;;  %v425_v22 = vmax.f32 %v291_v6, %v411_v17 }
 0x11f   :  { %v415_v24 = vpop.f32.mrf.mxu0 }
 0x120   :  { %v549_v25 = vpop.f32.mrf.mxu1  ;;  %v597_v26 = vmax.f32 %v589_v19, 0.0  ;;  %604 = vst [vmem:[%s1309_s3 + $0x10] sm:$0xff] %v596_v20  ;;  %v590_v27 = vadd.f32 %v579_v15, %v558_v21  ;;  %v559_v28 = vmax.f32 %v425_v22, %v545_v18  ;;  %v426_v8 = vmax.f32 %v292_v16, %v415_v24 }
 0x121   :  { %v417_v29 = vpop.f32.mrf.mxu0 }
 0x122   :  { %605 = vst [vmem:[%s1309_s3 + $0x18] sm:$0xff] %v597_v26  ;;  %v598_v10 = vmax.f32 %v590_v27, 0.0  ;;  %v591_v30 = vadd.f32 %v579_v15, %v559_v28  ;;  %v560_v31 = vmax.f32 %v426_v8, %v549_v25  ;;  %v427_v32 = vmax.f32 %v293_v23, %v417_v29  ;;  %v551_v34 = vpop.f32.mrf.mxu1 }
 0x124   :  { %606 = vst [vmem:[%s1309_s3 + $0x20] sm:$0xff] %v598_v10  ;;  %v599_v35 = vmax.f32 %v591_v30, 0.0  ;;  %v592_v36 = vadd.f32 %v584_v33, %v560_v31  ;;  %v561_v37 = vmax.f32 %v427_v32, %v551_v34 }
 0x126   :  { %607 = vst [vmem:[%s1309_s3 + $0x28] sm:$0xff] %v599_v35  ;;  %v600_v38 = vmax.f32 %v592_v36, 0.0  ;;  %v593_v39 = vadd.f32 %v584_v33, %v561_v37 }
 0x128   :  { %608 = vst [vmem:[%s1309_s3 + $0x30] sm:$0xff] %v600_v38  ;;  %v601_v40 = vmax.f32 %v593_v39, 0.0 }
 0x12a   :  { %609 = vst [vmem:[%s1309_s3 + $0x38] sm:$0xff] %v601_v40 }

// kernel: _lambda_.7
= control target key start
LH: loop header
LB: loop body
LE: loop exit
PB: predicated region body
PF: predicated region fallthrough
CT: control target
= control target key end

     0   :  { %s784_s0 = inlined_call_operand.vmem [shape: f32[16,512], index: 0, kind: input, shape index: {}]   ;;  %s785_s1 = inlined_call_operand.vmem [shape: f32[512,64], index: 1, kind: input, shape index: {}]   ;;  %s786_s2 = inlined_call_operand.vmem [shape: f32[1,64], index: 2, kind: input, shape index: {}]   ;;  %s787_s3 = inlined_call_operand.vmem [shape: f32[64,10], index: 3, kind: input, shape index: {}]   ;;  %s788_s4 = inlined_call_operand.vmem [shape: f32[1,10], index: 4, kind: input, shape index: {}]   ;;  %s789_s5 = inlined_call_operand.hbm [shape: f32[16,10], index: 5, kind: output, shape index: {}]  }
   0x1   :  { %v60_v0 = vld [vmem:[%s785_s1 + $0xf8] sm:$0xff]  ;;  %v59_v4 = vld [vmem:[%s785_s1 + $0xf0] sm:$0xff]  ;;  %v58_v8 = vld [vmem:[%s785_s1 + $0xe8] sm:$0xff] }
   0x2   :  { %v92_v1 = vld [vmem:[%s785_s1 + $0x1f8] sm:$0xff]  ;;  %372 = vmatprep.subr.mxu0 %v60_v0  ;;  %v91_v5 = vld [vmem:[%s785_s1 + $0x1f0] sm:$0xff]  ;;  %v90_v9 = vld [vmem:[%s785_s1 + $0x1e8] sm:$0xff] }
   0x3   :  { %v44_v2 = vld [vmem:[%s785_s1 + $0x78] sm:$0xff]  ;;  %410 = vmatprep.subr.mxu1 %v92_v1  ;;  %v43_v6 = vld [vmem:[%s785_s1 + $0x70] sm:$0xff]  ;;  %v42_v10 = vld [vmem:[%s785_s1 + $0x68] sm:$0xff] }
   0x4   :  { %v76_v3 = vld [vmem:[%s785_s1 + $0x178] sm:$0xff]  ;;  %373 = vmatpush3.msra.mxu0 %v44_v2  ;;  %v75_v7 = vld [vmem:[%s785_s1 + $0x170] sm:$0xff]  ;;  %v74_v11 = vld [vmem:[%s785_s1 + $0x168] sm:$0xff] }
   0x5   :  { %411 = vmatpush3.msra.mxu1 %v76_v3  ;;  %374 = vmatprep.subr.mxu0 %v59_v4  ;;  %v57_v12 = vld [vmem:[%s785_s1 + $0xe0] sm:$0xff]  ;;  %v56_v16 = vld [vmem:[%s785_s1 + $0xd8] sm:$0xff]  ;;  %v55_v20 = vld [vmem:[%s785_s1 + $0xd0] sm:$0xff] }
   0x6   :  { %412 = vmatprep.subr.mxu1 %v91_v5  ;;  %375 = vmatpush3.msra.mxu0 %v43_v6  ;;  %v89_v13 = vld [vmem:[%s785_s1 + $0x1e0] sm:$0xff]  ;;  %v88_v17 = vld [vmem:[%s785_s1 + $0x1d8] sm:$0xff]  ;;  %v87_v21 = vld [vmem:[%s785_s1 + $0x1d0] sm:$0xff] }
   0x7   :  { %413 = vmatpush3.msra.mxu1 %v75_v7  ;;  %376 = vmatprep.subr.mxu0 %v58_v8  ;;  %v41_v14 = vld [vmem:[%s785_s1 + $0x60] sm:$0xff]  ;;  %v40_v18 = vld [vmem:[%s785_s1 + $0x58] sm:$0xff]  ;;  %v39_v22 = vld [vmem:[%s785_s1 + $0x50] sm:$0xff] }
   0x8   :  { %414 = vmatprep.subr.mxu1 %v90_v9  ;;  %v73_v15 = vld [vmem:[%s785_s1 + $0x160] sm:$0xff]  ;;  %377 = vmatpush3.msra.mxu0 %v42_v10  ;;  %v72_v19 = vld [vmem:[%s785_s1 + $0x158] sm:$0xff]  ;;  %v71_v23 = vld [vmem:[%s785_s1 + $0x150] sm:$0xff] }
   0x9   :  { %415 = vmatpush3.msra.mxu1 %v74_v11  ;;  %378 = vmatprep.subr.mxu0 %v57_v12  ;;  %v54_v24 = vld [vmem:[%s785_s1 + $0xc8] sm:$0xff]  ;;  %v53_v28 = vld [vmem:[%s785_s1 + $0xc0] sm:$0xff]  ;;  %v52_v32 = vld [vmem:[%s785_s1 + $0xb8] sm:$0xff] }
   0xa   :  { %416 = vmatprep.subr.mxu1 %v89_v13  ;;  %379 = vmatpush3.msra.mxu0 %v41_v14  ;;  %v86_v25 = vld [vmem:[%s785_s1 + $0x1c8] sm:$0xff]  ;;  %v85_v29 = vld [vmem:[%s785_s1 + $0x1c0] sm:$0xff]  ;;  %v84_v33 = vld [vmem:[%s785_s1 + $0x1b8] sm:$0xff] }
   0xb   :  { %417 = vmatpush3.msra.mxu1 %v73_v15  ;;  %380 = vmatprep.subr.mxu0 %v56_v16  ;;  %v38_v26 = vld [vmem:[%s785_s1 + $0x48] sm:$0xff]  ;;  %v37_v30 = vld [vmem:[%s785_s1 + $0x40] sm:$0xff]  ;;  %v36_v34 = vld [vmem:[%s785_s1 + $0x38] sm:$0xff] }
   0xc   :  { %418 = vmatprep.subr.mxu1 %v88_v17  ;;  %381 = vmatpush3.msra.mxu0 %v40_v18  ;;  %v70_v27 = vld [vmem:[%s785_s1 + $0x148] sm:$0xff]  ;;  %v69_v31 = vld [vmem:[%s785_s1 + $0x140] sm:$0xff]  ;;  %v68_v35 = vld [vmem:[%s785_s1 + $0x138] sm:$0xff] }
   0xd   :  { %419 = vmatpush3.msra.mxu1 %v72_v19  ;;  %382 = vmatprep.subr.mxu0 %v55_v20  ;;  %v51_v36 = vld [vmem:[%s785_s1 + $0xb0] sm:$0xff]  ;;  %v50_v40 = vld [vmem:[%s785_s1 + $0xa8] sm:$0xff]  ;;  %v49_v44 = vld [vmem:[%s785_s1 + $0xa0] sm:$0xff] }
   0xe   :  { %420 = vmatprep.subr.mxu1 %v87_v21  ;;  %383 = vmatpush3.msra.mxu0 %v39_v22  ;;  %v83_v37 = vld [vmem:[%s785_s1 + $0x1b0] sm:$0xff]  ;;  %v82_v41 = vld [vmem:[%s785_s1 + $0x1a8] sm:$0xff]  ;;  %v81_v45 = vld [vmem:[%s785_s1 + $0x1a0] sm:$0xff] }
   0xf   :  { %421 = vmatpush3.msra.mxu1 %v71_v23  ;;  %384 = vmatprep.subr.mxu0 %v54_v24  ;;  %v35_v38 = vld [vmem:[%s785_s1 + $0x30] sm:$0xff]  ;;  %v34_v42 = vld [vmem:[%s785_s1 + $0x28] sm:$0xff]  ;;  %v33_v46 = vld [vmem:[%s785_s1 + $0x20] sm:$0xff] }
  0x10   :  { %422 = vmatprep.subr.mxu1 %v86_v25  ;;  %385 = vmatpush3.msra.mxu0 %v38_v26  ;;  %v67_v39 = vld [vmem:[%s785_s1 + $0x130] sm:$0xff]  ;;  %v66_v43 = vld [vmem:[%s785_s1 + $0x128] sm:$0xff]  ;;  %v65_v47 = vld [vmem:[%s785_s1 + $0x120] sm:$0xff] }
  0x11   :  { %423 = vmatpush3.msra.mxu1 %v70_v27  ;;  %386 = vmatprep.subr.mxu0 %v53_v28  ;;  %v48_v48 = vld [vmem:[%s785_s1 + $0x98] sm:$0xff]  ;;  %v47_v52 = vld [vmem:[%s785_s1 + $0x90] sm:$0xff] }
  0x12   :  { %424 = vmatprep.subr.mxu1 %v85_v29  ;;  %387 = vmatpush3.msra.mxu0 %v37_v30  ;;  %v80_v49 = vld [vmem:[%s785_s1 + $0x198] sm:$0xff]  ;;  %v79_v53 = vld [vmem:[%s785_s1 + $0x190] sm:$0xff] }
  0x13   :  { %425 = vmatpush3.msra.mxu1 %v69_v31  ;;  %388 = vmatprep.subr.mxu0 %v52_v32  ;;  %v32_v50 = vld [vmem:[%s785_s1 + $0x18] sm:$0xff] }
  0x14   :  { %426 = vmatprep.subr.mxu1 %v84_v33  ;;  %389 = vmatpush3.msra.mxu0 %v36_v34  ;;  %v64_v51 = vld [vmem:[%s785_s1 + $0x118] sm:$0xff] }
  0x15   :  { %427 = vmatpush3.msra.mxu1 %v68_v35  ;;  %390 = vmatprep.subr.mxu0 %v51_v36 }
  0x16   :  { %428 = vmatprep.subr.mxu1 %v83_v37  ;;  %391 = vmatpush3.msra.mxu0 %v35_v38 }
  0x17   :  { %429 = vmatpush3.msra.mxu1 %v67_v39  ;;  %392 = vmatprep.subr.mxu0 %v50_v40 }
  0x18   :  { %430 = vmatprep.subr.mxu1 %v82_v41  ;;  %393 = vmatpush3.msra.mxu0 %v34_v42 }
  0x19   :  { %431 = vmatpush3.msra.mxu1 %v66_v43  ;;  %394 = vmatprep.subr.mxu0 %v49_v44 }
  0x1a   :  { %432 = vmatprep.subr.mxu1 %v81_v45  ;;  %395 = vmatpush3.msra.mxu0 %v33_v46 }
  0x1b   :  { %433 = vmatpush3.msra.mxu1 %v65_v47 }
  0x1c   :  { %10 = vsyncpa [#allocation3], 0  ;;  %396 = vmatprep.subr.mxu0 %v48_v48  ;;  %434 = vmatprep.subr.mxu1 %v80_v49  ;;  %v31_v54 = vld [vmem:[%s785_s1 + $0x10] sm:$0xff]  ;;  %v46_v56 = vld [vmem:[%s785_s1 + $0x88] sm:$0xff]  ;;  %vm267_vm0 = vcmask 523264   ;;  %s502_s28 = smov [#allocation2]  }
  0x1d   :  { %v63_v55 = vld [vmem:[%s785_s1 + $0x110] sm:$0xff]  ;;  %397 = vmatpush3.msra.mxu0 %v32_v50  ;;  %435 = vmatpush3.msra.mxu1 %v64_v51  ;;  %v78_v57 = vld [vmem:[%s785_s1 + $0x188] sm:$0xff]  ;;  %v45_v60 = vld [vmem:[%s785_s1 + $0x80] sm:$0xff]  ;;  %s357_s29 = sshll.u32 %s502_s28, 4  ;;  %vm349_vm1 = vcmask 80896   ;;  %s358_s29 = int_to_ptr.vmem [resolvable:$true] %s357_s29 }
  0x1e   :  { %398 = vmatprep.subr.mxu0 %v47_v52  ;;  %436 = vmatprep.subr.mxu1 %v79_v53  ;;  %v30_v58 = vld [vmem:[%s785_s1 + $0x8] sm:$0xff]  ;;  %v77_v61 = vld [vmem:[%s785_s1 + $0x180] sm:$0xff]  ;;  %v24_v1 = vld [vmem:[%s784_s0 + $0x18] sm:$0xff]  ;;  %s480_s30 = scalar_lea.vmem %s358_s29, 256  ;;  %p485_p1 = scmp.lt.s32.totalorder %s358_s29, %s358_s29 }
  0x1f   :  { %v62_v59 = vld [vmem:[%s785_s1 + $0x108] sm:$0xff]  ;;  %399 = vmatpush3.msra.mxu0 %v31_v54  ;;  %437 = vmatpush3.msra.mxu1 %v63_v55  ;;  %v29_v62 = vld [vmem:[%s785_s1] sm:$0xff]  ;;  %v23_v3 = vld [vmem:[%s784_s0 + $0x10] sm:$0xff]  ;;  %p481_p0 = scmp.ne.s32.totalorder %s358_s29, %s480_s30  ;;  %p486_p2 = scmp.lt.s32.totalorder %s480_s30, %s480_s30 }
  0x20   :  { %400 = vmatprep.subr.mxu0 %v46_v56  ;;  %438 = vmatprep.subr.mxu1 %v78_v57  ;;  %v22_v63 = vld [vmem:[%s784_s0 + $0x8] sm:$0xff]  ;;  %v61_v0 = vld [vmem:[%s785_s1 + $0x100] sm:$0xff]  ;;  %v28_v5 = vld [vmem:[%s784_s0 + $0x38] sm:$0xff] }
  0x21   :  { %401 = vmatpush3.msra.mxu0 %v30_v58  ;;  %439 = vmatpush3.msra.mxu1 %v62_v59  ;;  %v21_v2 = vld [vmem:[%s784_s0] sm:$0xff]  ;;  %v26_v4 = vld [vmem:[%s784_s0 + $0x28] sm:$0xff]  ;;  %v259_v6 = vld [vmem:[%s787_s3 + $0x38] sm:$0xff]  ;;  %p487_p3 = por %p486_p2, %p485_p1 }
  0x22   :  { %402 = vmatprep.subr.mxu0 %v45_v60  ;;  %440 = vmatprep.subr.mxu1 %v77_v61  ;;  %v25_v7 = vld [vmem:[%s784_s0 + $0x20] sm:$0xff]  ;;  %v27_v8 = vld [vmem:[%s784_s0 + $0x30] sm:$0xff]  ;;  %v257_v10 = vld [vmem:[%s787_s3 + $0x28] sm:$0xff] }
  0x23   :  { %403 = vmatpush3.msra.mxu0 %v29_v62  ;;  %164 = vmatprep.mubr.f32.mxu0 %v22_v63  ;;  %v258_v9 = vld [vmem:[%s787_s3 + $0x30] sm:$0xff]  ;;  %v256_v11 = vld [vmem:[%s787_s3 + $0x20] sm:$0xff]  ;;  %v255_v12 = vld [vmem:[%s787_s3 + $0x18] sm:$0xff]  ;;  %p488_p4 = pnand %p487_p3, %p481_p0 }
  0x24   :  { %441 = vmatpush3.msra.mxu1 %v61_v0  ;;  %239 = vmatprep.mubr.f32.mxu1 %v24_v1  ;;  %v254_v13 = vld [vmem:[%s787_s3 + $0x10] sm:$0xff]  ;;  %v253_v14 = vld [vmem:[%s787_s3 + $0x8] sm:$0xff]  ;;  %v252_v15 = vld [vmem:[%s787_s3] sm:$0xff] }
  0x25   :  { %165 = vmatmul.mubr.f32.vlgmr.msra.gmra.mxu0 %v21_v2  ;;  %240 = vmatmul.mubr.f32.vlgmr.msra.gmra.mxu1 %v23_v3  ;;  %v368_v18 = vld [vmem:[%s786_s2] ss:$0 sm:$0xff] }
  0x26   :  { %169 = vmatprep.mubr.f32.mxu0 %v26_v4  ;;  %244 = vmatprep.mubr.f32.mxu1 %v28_v5  ;;  %v369_v35 = vld [vmem:[%s788_s4] ss:$0 sm:$0xff] }
  0x27   :  { %458 = vmatprep.subr.mxu0 %v259_v6 }
  0x28   :  { %459 = vmatpush3.msra.mxu0 %v259_v6 }
  0x29   :  { %170 = vmatmul.mubr.f32.gmra.mxu0 %v25_v7  ;;  %245 = vmatmul.mubr.f32.gmra.mxu1 %v27_v8 }
  0x2a   :  { %460 = vmatprep.subr.mxu0 %v258_v9 }
  0x2b   :  { %461 = vmatpush3.msra.mxu0 %v258_v9 }
  0x2c   :  { %462 = vmatprep.subr.mxu0 %v257_v10 }
  0x2d   :  { %463 = vmatpush3.msra.mxu0 %v257_v10 }
  0x2e   :  { %464 = vmatprep.subr.mxu0 %v256_v11 }
  0x2f   :  { %465 = vmatpush3.msra.mxu0 %v256_v11 }
  0x30   :  { %466 = vmatprep.subr.mxu0 %v255_v12 }
  0x31   :  { %467 = vmatpush3.msra.mxu0 %v255_v12 }
  0x32   :  { %468 = vmatprep.subr.mxu0 %v254_v13 }
  0x33   :  { %469 = vmatpush3.msra.mxu0 %v254_v13 }
  0x34   :  { %470 = vmatprep.subr.mxu0 %v253_v14 }
  0x35   :  { %471 = vmatpush3.msra.mxu0 %v253_v14 }
  0x36   :  { %472 = vmatprep.subr.mxu0 %v252_v15 }
  0x37   :  { %473 = vmatpush3.msra.mxu0 %v252_v15 }
  0xe5   :  { %v404_v16 = vpop.f32.mrf.mxu0  ;;  %v442_v17 = vpop.f32.mrf.mxu1 }
  0xe7   :  { %v405_v19 = vpop.f32.mrf.mxu0  ;;  %v443_v20 = vpop.f32.mrf.mxu1 }
  0xe8   :  { %v406_v21 = vadd.f32 %v405_v19, %v404_v16  ;;  %v444_v25 = vadd.f32 %v443_v20, %v442_v17 }
  0xe9   :  { %v407_v22 = vpop.f32.mrf.mxu0  ;;  %v445_v23 = vpop.f32.mrf.mxu1 }
  0xea   :  { %v167_v24 = vadd.f32 %v406_v21, %v368_v18 }
  0xeb   :  { %v408_v26 = vpop.f32.mrf.mxu0  ;;  %v446_v27 = vpop.f32.mrf.mxu1 }
  0xec   :  { %v242_v28 = vadd.f32 %v444_v25, %v167_v24  ;;  %v409_v29 = vadd.f32 %v408_v26, %v407_v22  ;;  %v447_v32 = vadd.f32 %v446_v27, %v445_v23 }
  0xee   :  { %v250_v30 = vmax.f32 %v242_v28, 0.0  ;;  %v172_v31 = vadd.f32 %v409_v29, %v368_v18 }
  0xf0   :  { %v247_v33 = vadd.f32 %v447_v32, %v172_v31  ;;  %474 = vmatprep.mubr.msk.f32.mxu0 %vm267_vm0, %v250_v30 }
  0xf2   :  { %v251_v34 = vmax.f32 %v247_v33, 0.0 }
  0xf4   :  { %475 = vmatmul.mubr.msk.f32.vlgmr.msra.gmra.mxu0 %vm267_vm0, %v251_v34 }
 0x1b4   :  { %v476_v36 = vpop.f32.mrf.mxu0 }
 0x1b5   :  { %v346_v37 = vadd.f32 %v476_v36, %v369_v35 }
 0x1b6   :  { %v340_v38 = vpop.f32.mrf.mxu0 }
 0x1b7   :  { %351 = vst.msk [vmem:[#allocation2 + $0x8] sm:$0xff] %vm349_vm1, %v346_v37  ;;  %v341_v39 = vadd.f32 %v369_v35, %v340_v38 }
 0x1b9   :  { %350 = vst.msk [vmem:[#allocation2] sm:$0xff] %vm349_vm1, %v341_v39 }
 0x1ba   :  { %491 = shalt.err (!%p488_p4)
}
 0x1bb   :  { %s503_s1 = smov 128   ;;  %s504_s6 = smov 8  }
 0x1bc   :  { %363 = dma.vmem_to_hbm [thread:$0]  %s358_s29, 256, %s789_s5, [#allocation3], %s503_s1, %s503_s1, %s504_s6  }
 0x1bd   :  { %500 = dma.done.wait [#allocation3], 256  }
 0x1be   :  { %501 = vsyncadd [#allocation3], 4294967040 }
 0x1bf   :  { %367 = vsyncpa [#allocation3], 1 }

</bundles_post_ra>
